<compile_context>
chip_gen: v7x
topology: tpu7x:2x2x1
jax: 0.10.0
libtpu: 0.0.40
codegen_flags: <defaults>
</compile_context>

<pallas_src>
import math

import numpy as np
import jax
import jax.numpy as jnp
from jax import lax
from jax.experimental import pallas as pl
from jax.experimental.pallas import tpu as pltpu

# ---------------- config (synthetic, mirrors MISA.__init__ shapes) ----------
TEXT_DIM = 768        # BERT hidden size (use_bert=True path)
VISUAL_DIM = 20       # feature_dims[2]
ACOUSTIC_DIM = 5      # feature_dims[1]
HIDDEN = 32           # config.hidden_size
OUTPUT = 1            # regression head
VOCAB = 50
SEQ = 8
BATCH = 4             # >= 3 required by p1 = cat(shared_a[0], shared_v[1], shared_t[2])

SCALE_ATTNN = (HIDDEN // 2) ** (-0.5)   # Attention(dim=H, num_heads=2 default)
SCALE_MHA = (HIDDEN // 8) ** (-0.5)     # Block(dim=H, num_heads=8)

# Row layout of the packed "vecs" slab (each row zero-padded to width VEC_W).
R_BT, R_GT, R_BET = 0, 1, 2               # project_t bias / LN gamma / LN beta
R_B_AV, R_G_AV, R_BE_AV = 3, 4, 5         # [a|v] proj bias / LN gamma / LN beta
R_B_PS = 6                                # combined private+shared bias (256 wide)
R_B_ATTNN = 7                             # attnn proj bias (tiled x3)
R_N1G, R_N1B = 8, 9                       # Block norm1
R_B_MHA = 10                              # mha proj bias (tiled x3)
R_N2G, R_N2B = 11, 12                     # Block norm2
R_FC1B, R_FC2B = 13, 14                   # Block MLP biases
R_BF1, R_WF3, R_BF3 = 15, 16, 17          # fusion1 bias, fusion3 weight row, fusion3 bias
N_VEC_ROWS = 18
VEC_W = 256


def _scramble_perm(h):
    """Permutation matrix P s.t. C_cat @ (P @ kron(I3, W)) equals the torch
    (attn @ v).transpose(0, 1).reshape(3, h) "scramble" followed by Linear W,
    with the three output tokens lane-concatenated (out[0]|out[1]|out[2])."""
    n = 3 * h
    p = np.zeros((n, n), np.float32)
    for m in range(n):
        p[(m % 3) * h + (m // 3), m] = 1.0
    return p


_SCRAMBLE_PERM = _scramble_perm(HIDDEN)


# ====================== Pallas mega-kernel (dense tail) =====================

def _dense_tail_kernel(xt_ref, xva_ref, wt_ref, wva_ref, wps_ref, w96_ref,
                       wmlp_ref, vecs_ref, o_ref):
    f32 = jnp.float32
    H = HIDDEN
    B = o_ref.shape[0]

    def dot(a, b):
        return jnp.dot(a, b, preferred_element_type=f32)

    def layer_norm(y, g, b):
        mu = jnp.mean(y, axis=-1, keepdims=True)
        var = jnp.mean((y - mu) ** 2, axis=-1, keepdims=True)
        return (y - mu) * lax.rsqrt(var + 1e-5) * g + b

    def row(i, w):
        # lazy (1, w) load of one packed bias/LN row at its use site
        return vecs_ref[i:i + 1, 0:w]

    # ---- project_t / project_v / project_a : Linear + ReLU + LayerNorm ----
    ut = layer_norm(jnp.maximum(dot(xt_ref[...], wt_ref[...]) + row(R_BT, H), 0.0),
                    row(R_GT, H), row(R_BET, H))
    uva = jnp.maximum(dot(xva_ref[...], wva_ref[...]) + row(R_B_AV, 2 * H), 0.0)
    g_av, be_av = row(R_G_AV, 2 * H), row(R_BE_AV, 2 * H)
    ua = layer_norm(uva[:, 0:H], g_av[:, 0:H], be_av[:, 0:H])
    uv = layer_norm(uva[:, H:2 * H], g_av[:, H:2 * H], be_av[:, H:2 * H])
    u_cat = jnp.concatenate([ua, uv, ut], axis=-1)                     # (B,3H) order a,v,t

    # ---- private / shared sigmoid heads: ONE (B,96)@(96,256) matmul ----
    ps = jax.nn.sigmoid(dot(u_cat, wps_ref[...]) + row(R_B_PS, 8 * H))  # (B,256)
    priv = ps[:, 0:3 * H]                                              # [pa|pv|pt]
    shar = ps[:, 4 * H:7 * H]                                          # [sa|sv|st]
    sa, sv, st = shar[:, 0:H], shar[:, H:2 * H], shar[:, 2 * H:3 * H]

    def modal_attention(q_toks, kv_toks, scale):
        """softmax(q @ k^T * scale) @ v over the 3 modality tokens per sample.
        Returns the 3 output tokens lane-concatenated as (B, 3H)."""
        outs = []
        for i in range(3):
            lg = [jnp.sum(q_toks[i] * kv_toks[j], axis=-1, keepdims=True) * scale
                  for j in range(3)]
            mx = jnp.maximum(jnp.maximum(lg[0], lg[1]), lg[2])
            ex = [jnp.exp(l - mx) for l in lg]
            den = ex[0] + ex[1] + ex[2]
            outs.append((ex[0] * kv_toks[0] + ex[1] * kv_toks[1]
                         + ex[2] * kv_toks[2]) / den)
        return jnp.concatenate(outs, axis=-1)

    # ---- attention 1 (self.attnn) ----
    # TODO(synk): reference calls self.attnn(h) with the q argument missing;
    # interpreted as per-sample self-attention (q == x) over the 3 modality tokens.
    c1 = modal_attention([sa, sv, st], [sa, sv, st], SCALE_ATTNN)      # (B,3H)
    p2 = dot(c1, w96_ref[0]) + row(R_B_ATTNN, 3 * H)                   # scramble+proj fold

    # p = p1 + p2 ; p1 = cat(shared_a[0], shared_v[1], shared_t[2]) broadcast over batch
    q_toks = [p2[:, 0:H] + sa[0:1, :],
              p2[:, H:2 * H] + sv[1:2, :],
              p2[:, 2 * H:3 * H] + st[2:3, :]]

    # ---- Block (self.mha): pre-LN attention with external q, residual, MLP ----
    # TODO(synk): reference stacks the private nn.Sequential modules as h2;
    # interpreted as the private-projection tensors (a, v, t).
    pa, pv, pt = priv[:, 0:H], priv[:, H:2 * H], priv[:, 2 * H:3 * H]
    n1_g, n1_b = row(R_N1G, H), row(R_N1B, H)
    xn = [layer_norm(t, n1_g, n1_b) for t in (pa, pv, pt)]
    c2 = modal_attention(q_toks, xn, SCALE_MHA)                        # (B,3H)
    data = dot(c2, w96_ref[1]) + row(R_B_MHA, 3 * H)                   # scramble+proj fold
    y = priv + data                                                    # residual, (B,3H)

    # MLP (norm2 -> fc1 -> GELU -> fc2), the 3 tokens stacked over sublanes
    y_stack = jnp.concatenate([y[:, 0:H], y[:, H:2 * H], y[:, 2 * H:3 * H]],
                              axis=0)                                  # (3B, H)
    yn = layer_norm(y_stack, row(R_N2G, H), row(R_N2B, H))
    # TODO(synk): nn.GELU() is the exact erf form; tanh approximation used here.
    hmid = jax.nn.gelu(dot(yn, wmlp_ref[0:H, :]) + row(R_FC1B, 4 * H),
                       approximate=True)                               # (3B, 4H)
    h_stack = y_stack + dot(hmid, wmlp_ref[H:5 * H, 0:H]) + row(R_FC2B, H)
    h_cat = jnp.concatenate([h_stack[0:B, :], h_stack[B:2 * B, :],
                             h_stack[2 * B:3 * B, :]], axis=-1)        # (B, 3H)

    # ---- fusion head: Linear(3H->3H) + ReLU + Linear(3H->1) ----
    f1 = jnp.maximum(dot(h_cat, w96_ref[2]) + row(R_BF1, 3 * H), 0.0)
    o_ref[...] = (jnp.sum(f1 * row(R_WF3, 3 * H), axis=-1, keepdims=True)
                  + vecs_ref[R_BF3:R_BF3 + 1, 0:1])


def dense_tail(prep, utt_text, utt_va):
    """One grid-less Pallas kernel for everything after the GRUs -> (B, 1)."""
    B = utt_text.shape[0]
    vmem = pl.BlockSpec(memory_space=pltpu.MemorySpace.VMEM)
    return pl.pallas_call(
        _dense_tail_kernel,
        out_shape=jax.ShapeDtypeStruct((B, OUTPUT), jnp.float32),
        in_specs=[vmem] * 8,
        out_specs=vmem,
    )(utt_text.astype(jnp.bfloat16), utt_va,
      prep["wt"], prep["w_va"], prep["w_ps"], prep["w96"], prep["w_mlp"],
      prep["vecs"])


# ================= one-time parameter packing (outside jit) =================

def prepare_params(params):
    H = HIDDEN
    mp = params["mha"]
    f32 = jnp.float32

    def bd(*mats):
        rows = []
        for i, m in enumerate(mats):
            blocks = [m if j == i else jnp.zeros((m.shape[0], mj.shape[1]), f32)
                      for j, mj in enumerate(mats)]
            rows.append(jnp.concatenate(blocks, axis=1))
        return jnp.concatenate(rows, axis=0)

    perm = jnp.asarray(_SCRAMBLE_PERM)
    eye3 = jnp.eye(3, dtype=f32)

    # torch (attn@v).transpose(0,1).reshape + Linear folded into one matmul
    w_attnn_comb = perm @ jnp.kron(eye3, params["attnn_proj"]["w"])     # (3H,3H)
    b_attnn_comb = jnp.tile(params["attnn_proj"]["b"], (1, 3))
    w_mha_comb = perm @ jnp.kron(eye3, mp["proj_w"])                    # (3H,3H)
    b_mha_comb = jnp.tile(mp["proj_b"], (1, 3))

    # visual + acoustic projections folded into one block-diag matmul ([a|v] cols)
    w_va = bd(params["project_a"]["w"], params["project_v"]["w"])       # (100, 64)

    # private + shared sigmoid heads on U=[ua|uv|ut]: one (96,256) weight
    w_priv = bd(params["private_a"]["w"], params["private_v"]["w"],
                params["private_t"]["w"])                               # (96,96)
    w_sh = bd(params["shared"]["w"], params["shared"]["w"], params["shared"]["w"])
    pad_m = jnp.zeros((3 * H, H), f32)
    w_ps = jnp.concatenate([w_priv, pad_m, w_sh, pad_m], axis=1)        # (96,256)
    b_priv = jnp.concatenate([params["private_a"]["b"], params["private_v"]["b"],
                              params["private_t"]["b"]], axis=1)
    b_sh = jnp.tile(params["shared"]["b"], (1, 3))
    pad_v = jnp.zeros((1, H), f32)
    b_ps = jnp.concatenate([b_priv, pad_v, b_sh, pad_v], axis=1)        # (1,256)

    # Block MLP weights packed into one slab: rows 0:32 fc1 (32x128),
    # rows 32:160 / cols 0:32 fc2 (128x32)
    w_mlp = jnp.zeros((5 * H, 4 * H), f32)
    w_mlp = w_mlp.at[0:H, :].set(mp["fc1_w"])
    w_mlp = w_mlp.at[H:5 * H, 0:H].set(mp["fc2_w"])

    # stack of the three combined 96x96 matrices
    w96 = jnp.stack([w_attnn_comb, w_mha_comb, params["fusion1"]["w"]], axis=0)

    def row(v):
        v = jnp.asarray(v, f32).reshape(1, -1)
        return jnp.pad(v, ((0, 0), (0, VEC_W - v.shape[1])))

    def cat1(*vs):
        return jnp.concatenate([jnp.asarray(v, f32).reshape(1, -1) for v in vs],
                               axis=1)

    vecs = jnp.concatenate([
        row(params["project_t"]["b"]),                                   # R_BT
        row(params["project_t"]["ln_g"]),                                # R_GT
        row(params["project_t"]["ln_b"]),                                # R_BET
        row(cat1(params["project_a"]["b"], params["project_v"]["b"])),   # R_B_AV
        row(cat1(params["project_a"]["ln_g"], params["project_v"]["ln_g"])),  # R_G_AV
        row(cat1(params["project_a"]["ln_b"], params["project_v"]["ln_b"])),  # R_BE_AV
        row(b_ps),                                                       # R_B_PS
        row(b_attnn_comb),                                               # R_B_ATTNN
        row(mp["n1_g"]), row(mp["n1_b"]),                                # R_N1G/B
        row(b_mha_comb),                                                 # R_B_MHA
        row(mp["n2_g"]), row(mp["n2_b"]),                                # R_N2G/B
        row(mp["fc1_b"]), row(mp["fc2_b"]),                              # R_FC1B/2B
        row(params["fusion1"]["b"]),                                     # R_BF1
        row(params["fusion3"]["w"].T),                                   # R_WF3
        row(params["fusion3"]["b"]),                                     # R_BF3
    ], axis=0)
    assert vecs.shape == (N_VEC_ROWS, VEC_W)

    return {
        "wt": params["project_t"]["w"].astype(jnp.bfloat16),
        "w_va": w_va, "w_ps": w_ps, "w96": w96, "w_mlp": w_mlp, "vecs": vecs,
        # plain-JAX glue params
        "emb": params["emb"],
        "vrnn1": params["vrnn1"], "vrnn2": params["vrnn2"], "vln": params["vln"],
        "arnn1": params["arnn1"], "arnn2": params["arnn2"], "aln": params["aln"],
    }


# ============================ plain-JAX glue ================================

def gru_bidir(x_bld, p):
    """Bidirectional single-layer GRU (PyTorch gate order r,z,n).
    Forward/backward directions fused into one recurrence; input projections
    hoisted out of the (fully unrolled) time loop."""
    B, L, D = x_bld.shape
    h = p["f"]["Whh"].shape[1]
    x_t = jnp.transpose(x_bld, (1, 0, 2))                                # (L,B,D)
    gx_f = jnp.einsum("lbd,gd->lbg", x_t, p["f"]["Wih"]) + p["f"]["bih"]
    gx_b = jnp.einsum("lbd,gd->lbg", x_t[::-1], p["b"]["Wih"]) + p["b"]["bih"]
    gx = jnp.concatenate([gx_f, gx_b], axis=-1).reshape(L, B, 2, 3, h)
    zeros = jnp.zeros((h, 3 * h), jnp.float32)
    whh_bd = jnp.block([[p["f"]["Whh"].T, zeros], [zeros, p["b"]["Whh"].T]])  # (2h,6h)
    bhh = jnp.concatenate([p["f"]["bhh"], p["b"]["bhh"]])                     # (6h,)

    hid = jnp.zeros((B, 2, h), jnp.float32)
    outs = []
    for t in range(L):                   # static L -> fully unrolled under jit
        gh = (hid.reshape(B, 2 * h) @ whh_bd + bhh).reshape(B, 2, 3, h)
        gxt = gx[t]
        r = jax.nn.sigmoid(gxt[:, :, 0] + gh[:, :, 0])
        zg = jax.nn.sigmoid(gxt[:, :, 1] + gh[:, :, 1])
        n = jnp.tanh(gxt[:, :, 2] + r * gh[:, :, 2])
        hid = (1.0 - zg) * n + zg * hid
        outs.append(hid)
    hs = jnp.stack(outs, axis=0)                                         # (L,B,2,h)
    padded = jnp.concatenate([hs[:, :, 0, :], hs[::-1, :, 1, :]], axis=-1)  # (L,B,2h)
    final = jnp.stack([hs[L - 1, :, 0, :], hs[L - 1, :, 1, :]], axis=0)  # (2,B,h)
    return padded, final


def extract_features(seq, rnn1_p, rnn2_p, ln_p):
    # TODO(synk): pack_padded_sequence variable-length handling not modeled;
    # all sequences are treated as full length (mask is all ones in this demo).
    padded_h1, final_h1 = gru_bidir(seq, rnn1_p)
    padded_h1 = jnp.transpose(padded_h1, (1, 0, 2))                      # (B,L,2h)
    mu = jnp.mean(padded_h1, axis=-1, keepdims=True)
    var = jnp.mean((padded_h1 - mu) ** 2, axis=-1, keepdims=True)
    normed = (padded_h1 - mu) * lax.rsqrt(var + 1e-5) * ln_p["g"] + ln_p["b"]
    _, final_h2 = gru_bidir(normed, rnn2_p)
    return final_h1, final_h2


# ============================ parameters ====================================

def linear_params(key, fan_in, fan_out):
    k1, k2 = jax.random.split(key)
    lim = 1.0 / math.sqrt(fan_in)
    return {"w": jax.random.uniform(k1, (fan_in, fan_out), jnp.float32, -lim, lim),
            "b": jax.random.uniform(k2, (1, fan_out), jnp.float32, -lim, lim)}


def gru_dir_params(key, in_dim, hid):
    ks = jax.random.split(key, 4)
    lim = 1.0 / math.sqrt(hid)
    return {"Wih": jax.random.uniform(ks[0], (3 * hid, in_dim), jnp.float32, -lim, lim),
            "Whh": jax.random.uniform(ks[1], (3 * hid, hid), jnp.float32, -lim, lim),
            "bih": jax.random.uniform(ks[2], (3 * hid,), jnp.float32, -lim, lim),
            "bhh": jax.random.uniform(ks[3], (3 * hid,), jnp.float32, -lim, lim)}


def gru_params(key, in_dim, hid):
    kf, kb = jax.random.split(key)
    return {"f": gru_dir_params(kf, in_dim, hid), "b": gru_dir_params(kb, in_dim, hid)}


def init_params(key):
    keys = iter(jax.random.split(key, 64))
    nk = lambda: next(keys)
    p = {}
    # TODO(synk): BertTextEncoder (pretrained transformer) replaced by a
    # deterministic embedding table; masked mean-pooling below is faithful.
    p["emb"] = 0.02 * jax.random.normal(nk(), (VOCAB, TEXT_DIM), jnp.float32)
    p["vrnn1"] = gru_params(nk(), VISUAL_DIM, VISUAL_DIM)
    p["vrnn2"] = gru_params(nk(), 2 * VISUAL_DIM, VISUAL_DIM)
    p["arnn1"] = gru_params(nk(), ACOUSTIC_DIM, ACOUSTIC_DIM)
    p["arnn2"] = gru_params(nk(), 2 * ACOUSTIC_DIM, ACOUSTIC_DIM)
    p["vln"] = {"g": jnp.ones((2 * VISUAL_DIM,), jnp.float32),
                "b": jnp.zeros((2 * VISUAL_DIM,), jnp.float32)}
    p["aln"] = {"g": jnp.ones((2 * ACOUSTIC_DIM,), jnp.float32),
                "b": jnp.zeros((2 * ACOUSTIC_DIM,), jnp.float32)}

    def lin_ln(fi, fo):
        d = linear_params(nk(), fi, fo)
        d["ln_g"] = jnp.ones((1, fo), jnp.float32)
        d["ln_b"] = jnp.zeros((1, fo), jnp.float32)
        return d

    p["project_t"] = lin_ln(TEXT_DIM, HIDDEN)          # use_bert: in_features=768
    p["project_v"] = lin_ln(4 * VISUAL_DIM, HIDDEN)
    p["project_a"] = lin_ln(4 * ACOUSTIC_DIM, HIDDEN)
    p["private_t"] = linear_params(nk(), HIDDEN, HIDDEN)
    p["private_v"] = linear_params(nk(), HIDDEN, HIDDEN)
    p["private_a"] = linear_params(nk(), HIDDEN, HIDDEN)
    p["shared"] = linear_params(nk(), HIDDEN, HIDDEN)
    p["attnn_proj"] = linear_params(nk(), HIDDEN, HIDDEN)
    mha = {"n1_g": jnp.ones((1, HIDDEN), jnp.float32),
           "n1_b": jnp.zeros((1, HIDDEN), jnp.float32),
           "n2_g": jnp.ones((1, HIDDEN), jnp.float32),
           "n2_b": jnp.zeros((1, HIDDEN), jnp.float32)}
    d = linear_params(nk(), HIDDEN, HIDDEN); mha["proj_w"], mha["proj_b"] = d["w"], d["b"]
    d = linear_params(nk(), HIDDEN, 4 * HIDDEN); mha["fc1_w"], mha["fc1_b"] = d["w"], d["b"]
    d = linear_params(nk(), 4 * HIDDEN, HIDDEN); mha["fc2_w"], mha["fc2_b"] = d["w"], d["b"]
    p["mha"] = mha
    # TODO(synk): fusion_layer_1 is declared with in_features=6*hidden in __init__
    # but the forward only produces 3*hidden features; in_features adjusted to 3*hidden.
    p["fusion1"] = linear_params(nk(), 3 * HIDDEN, 3 * HIDDEN)
    p["fusion3"] = linear_params(nk(), 3 * HIDDEN, OUTPUT)
    # Note: outT/outV/outA/outC, HSIC, weight_dot and reconstruct() belong to the
    # side path that never feeds the returned output 'M'; they are omitted.
    return p


# ============================ MISA forward ==================================

def _misa_forward(prep, text, audio, video):
    # forward(text, audio, video) -> alignment(sentences=text, visual=video, acoustic=audio)
    B = text.shape[0]
    assert B >= 3, "reference indexes batch rows 0/1/2 when forming p1"

    # ---- text: surrogate BERT + masked mean pooling ----
    ids = text[:, 0, :].astype(jnp.int32)
    mask = text[:, 1, :].astype(jnp.float32)
    bert_output = prep["emb"][ids]                    # (B, L, 768)
    masked_output = mask[:, :, None] * bert_output
    mask_len = jnp.sum(mask, axis=1, keepdims=True)
    utterance_text = jnp.sum(masked_output, axis=1) / mask_len

    # ---- visual / acoustic stacked bidirectional GRUs ----
    f1v, f2v = extract_features(video, prep["vrnn1"], prep["vrnn2"], prep["vln"])
    utterance_video = jnp.transpose(jnp.concatenate([f1v, f2v], axis=2),
                                    (1, 0, 2)).reshape(B, -1)            # (B, 4*20)
    f1a, f2a = extract_features(audio, prep["arnn1"], prep["arnn2"], prep["aln"])
    utterance_audio = jnp.transpose(jnp.concatenate([f1a, f2a], axis=2),
                                    (1, 0, 2)).reshape(B, -1)            # (B, 4*5)

    # acoustic|visual lane-concatenated to match the block-diag projection weight
    utt_va = jnp.concatenate([utterance_audio, utterance_video], axis=1)  # (B, 100)

    # ---- single Pallas mega-kernel: projections -> sigmoids -> attnn ->
    #      Block(mha) -> fusion head -> (B, 1) ----
    o = dense_tail(prep, utterance_text, utt_va)

    # Side path of the reference forward (HSIC stats, weight_dot, outT/A/V/C,
    # reconstruct) does not feed the returned output 'M' and is omitted.
    return {"M": o}


misa_forward = jax.jit(_misa_forward)


# ============================ main ==========================================

if __name__ == "__main__":
    key = jax.random.PRNGKey(0)
    kp, kt, ka, kv = jax.random.split(key, 4)
    params = init_params(kp)
    prep = prepare_params(params)        # one-time packing, outside the jitted step

    B, L = BATCH, SEQ
    ids = jax.random.randint(kt, (B, L), 0, VOCAB).astype(jnp.float32)
    mask = jnp.ones((B, L), jnp.float32)          # full-length sequences
    types = jnp.zeros((B, L), jnp.float32)
    text = jnp.stack([ids, mask, types], axis=1)  # (B, 3, L)
    audio = jax.random.normal(ka, (B, L, ACOUSTIC_DIM), jnp.float32)
    video = jax.random.normal(kv, (B, L, VISUAL_DIM), jnp.float32)

    out = misa_forward(prep, text, audio, video)
    o = jax.block_until_ready(out["M"])
    assert o.shape == (B, OUTPUT) and bool(jnp.all(jnp.isfinite(o)))
    print("KERNEL_OK")
</pallas_src>

<mosaic_0001>
module attributes {stable_mosaic.version = 11 : i64} {
  func.func @_dense_tail_kernel(%arg0: memref<4x768xbf16, #tpu.memory_space<vmem>>, %arg1: memref<4x100xf32, #tpu.memory_space<vmem>>, %arg2: memref<768x32xbf16, #tpu.memory_space<vmem>>, %arg3: memref<100x64xf32, #tpu.memory_space<vmem>>, %arg4: memref<96x256xf32, #tpu.memory_space<vmem>>, %arg5: memref<3x96x96xf32, #tpu.memory_space<vmem>>, %arg6: memref<160x128xf32, #tpu.memory_space<vmem>>, %arg7: memref<18x256xf32, #tpu.memory_space<vmem>>, %arg8: memref<4x1xf32, #tpu.memory_space<vmem>>) attributes {dimension_semantics = [], scalar_prefetch = 0 : i64, scratch_operands = 0 : i64, tpu.core_type = #tpu.core_type<tc>} {
    %c0 = arith.constant 0 : index
    %c0_0 = arith.constant 0 : index
    %0 = vector.load %arg0[%c0, %c0_0] : memref<4x768xbf16, #tpu.memory_space<vmem>>, vector<4x768xbf16>
    %c0_1 = arith.constant 0 : index
    %c0_2 = arith.constant 0 : index
    %1 = vector.load %arg2[%c0_1, %c0_2] : memref<768x32xbf16, #tpu.memory_space<vmem>>, vector<768x32xbf16>
    %cst = arith.constant dense<0.000000e+00> : vector<4x32xf32>
    %2 = tpu.matmul %0, %1, %cst {dimension_numbers = #tpu.dot_dimension_numbers<[1], [0], [0], [1], [0, 0, 1, 1], [], []>} : vector<4x768xbf16>, vector<768x32xbf16>, vector<4x32xf32> -> vector<4x32xf32>
    %c0_3 = arith.constant 0 : index
    %c0_4 = arith.constant 0 : index
    %3 = vector.load %arg7[%c0_3, %c0_4] : memref<18x256xf32, #tpu.memory_space<vmem>>, vector<1x32xf32>
    %4 = vector.broadcast %3 : vector<1x32xf32> to vector<4x32xf32>
    %5 = arith.addf %2, %4 : vector<4x32xf32>
    %cst_5 = arith.constant 0.000000e+00 : f32
    %6 = vector.broadcast %cst_5 : f32 to vector<4x32xf32>
    %7 = arith.maximumf %5, %6 : vector<4x32xf32>
    %c1 = arith.constant 1 : index
    %c0_6 = arith.constant 0 : index
    %8 = vector.load %arg7[%c1, %c0_6] : memref<18x256xf32, #tpu.memory_space<vmem>>, vector<1x32xf32>
    %c2 = arith.constant 2 : index
    %c0_7 = arith.constant 0 : index
    %9 = vector.load %arg7[%c2, %c0_7] : memref<18x256xf32, #tpu.memory_space<vmem>>, vector<1x32xf32>
    %cst_8 = arith.constant dense<0.000000e+00> : vector<4xf32>
    %10 = vector.multi_reduction <add>, %7, %cst_8 [1] : vector<4x32xf32> to vector<4xf32>
    %11 = vector.shape_cast %10 : vector<4xf32> to vector<4x1xf32>
    %cst_9 = arith.constant 3.200000e+01 : f32
    %12 = vector.broadcast %cst_9 : f32 to vector<4x1xf32>
    %13 = arith.divf %11, %12 : vector<4x1xf32>
    %14 = vector.broadcast %13 : vector<4x1xf32> to vector<4x32xf32>
    %15 = arith.subf %7, %14 : vector<4x32xf32>
    %16 = arith.mulf %15, %15 : vector<4x32xf32>
    %cst_10 = arith.constant dense<0.000000e+00> : vector<4xf32>
    %17 = vector.multi_reduction <add>, %16, %cst_10 [1] : vector<4x32xf32> to vector<4xf32>
    %18 = vector.shape_cast %17 : vector<4xf32> to vector<4x1xf32>
    %cst_11 = arith.constant 3.200000e+01 : f32
    %19 = vector.broadcast %cst_11 : f32 to vector<4x1xf32>
    %20 = arith.divf %18, %19 : vector<4x1xf32>
    %21 = vector.broadcast %13 : vector<4x1xf32> to vector<4x32xf32>
    %22 = arith.subf %7, %21 : vector<4x32xf32>
    %cst_12 = arith.constant 9.99999974E-6 : f32
    %23 = vector.broadcast %cst_12 : f32 to vector<4x1xf32>
    %24 = arith.addf %20, %23 : vector<4x1xf32>
    %25 = math.rsqrt %24 : vector<4x1xf32>
    %26 = vector.broadcast %25 : vector<4x1xf32> to vector<4x32xf32>
    %27 = arith.mulf %22, %26 : vector<4x32xf32>
    %28 = vector.broadcast %8 : vector<1x32xf32> to vector<4x32xf32>
    %29 = arith.mulf %27, %28 : vector<4x32xf32>
    %30 = vector.broadcast %9 : vector<1x32xf32> to vector<4x32xf32>
    %31 = arith.addf %29, %30 : vector<4x32xf32>
    %c0_13 = arith.constant 0 : index
    %c0_14 = arith.constant 0 : index
    %32 = vector.load %arg1[%c0_13, %c0_14] : memref<4x100xf32, #tpu.memory_space<vmem>>, vector<4x100xf32>
    %c0_15 = arith.constant 0 : index
    %c0_16 = arith.constant 0 : index
    %33 = vector.load %arg3[%c0_15, %c0_16] : memref<100x64xf32, #tpu.memory_space<vmem>>, vector<100x64xf32>
    %cst_17 = arith.constant dense<0.000000e+00> : vector<4x64xf32>
    %34 = tpu.matmul %32, %33, %cst_17 {dimension_numbers = #tpu.dot_dimension_numbers<[1], [0], [0], [1], [0, 0, 1, 1], [], []>} : vector<4x100xf32>, vector<100x64xf32>, vector<4x64xf32> -> vector<4x64xf32>
    %c3 = arith.constant 3 : index
    %c0_18 = arith.constant 0 : index
    %35 = vector.load %arg7[%c3, %c0_18] : memref<18x256xf32, #tpu.memory_space<vmem>>, vector<1x64xf32>
    %36 = vector.broadcast %35 : vector<1x64xf32> to vector<4x64xf32>
    %37 = arith.addf %34, %36 : vector<4x64xf32>
    %cst_19 = arith.constant 0.000000e+00 : f32
    %38 = vector.broadcast %cst_19 : f32 to vector<4x64xf32>
    %39 = arith.maximumf %37, %38 : vector<4x64xf32>
    %c4 = arith.constant 4 : index
    %c0_20 = arith.constant 0 : index
    %40 = vector.load %arg7[%c4, %c0_20] : memref<18x256xf32, #tpu.memory_space<vmem>>, vector<1x64xf32>
    %c5 = arith.constant 5 : index
    %c0_21 = arith.constant 0 : index
    %41 = vector.load %arg7[%c5, %c0_21] : memref<18x256xf32, #tpu.memory_space<vmem>>, vector<1x64xf32>
    %42 = vector.extract_strided_slice %39 {offsets = [0, 0], sizes = [4, 32], strides = [1, 1]} : vector<4x64xf32> to vector<4x32xf32>
    %43 = vector.extract_strided_slice %40 {offsets = [0, 0], sizes = [1, 32], strides = [1, 1]} : vector<1x64xf32> to vector<1x32xf32>
    %44 = vector.extract_strided_slice %41 {offsets = [0, 0], sizes = [1, 32], strides = [1, 1]} : vector<1x64xf32> to vector<1x32xf32>
    %cst_22 = arith.constant dense<0.000000e+00> : vector<4xf32>
    %45 = vector.multi_reduction <add>, %42, %cst_22 [1] : vector<4x32xf32> to vector<4xf32>
    %46 = vector.shape_cast %45 : vector<4xf32> to vector<4x1xf32>
    %cst_23 = arith.constant 3.200000e+01 : f32
    %47 = vector.broadcast %cst_23 : f32 to vector<4x1xf32>
    %48 = arith.divf %46, %47 : vector<4x1xf32>
    %49 = vector.broadcast %48 : vector<4x1xf32> to vector<4x32xf32>
    %50 = arith.subf %42, %49 : vector<4x32xf32>
    %51 = arith.mulf %50, %50 : vector<4x32xf32>
    %cst_24 = arith.constant dense<0.000000e+00> : vector<4xf32>
    %52 = vector.multi_reduction <add>, %51, %cst_24 [1] : vector<4x32xf32> to vector<4xf32>
    %53 = vector.shape_cast %52 : vector<4xf32> to vector<4x1xf32>
    %cst_25 = arith.constant 3.200000e+01 : f32
    %54 = vector.broadcast %cst_25 : f32 to vector<4x1xf32>
    %55 = arith.divf %53, %54 : vector<4x1xf32>
    %56 = vector.broadcast %48 : vector<4x1xf32> to vector<4x32xf32>
    %57 = arith.subf %42, %56 : vector<4x32xf32>
    %cst_26 = arith.constant 9.99999974E-6 : f32
    %58 = vector.broadcast %cst_26 : f32 to vector<4x1xf32>
    %59 = arith.addf %55, %58 : vector<4x1xf32>
    %60 = math.rsqrt %59 : vector<4x1xf32>
    %61 = vector.broadcast %60 : vector<4x1xf32> to vector<4x32xf32>
    %62 = arith.mulf %57, %61 : vector<4x32xf32>
    %63 = vector.broadcast %43 : vector<1x32xf32> to vector<4x32xf32>
    %64 = arith.mulf %62, %63 : vector<4x32xf32>
    %65 = vector.broadcast %44 : vector<1x32xf32> to vector<4x32xf32>
    %66 = arith.addf %64, %65 : vector<4x32xf32>
    %67 = vector.extract_strided_slice %39 {offsets = [0, 32], sizes = [4, 32], strides = [1, 1]} : vector<4x64xf32> to vector<4x32xf32>
    %68 = vector.extract_strided_slice %40 {offsets = [0, 32], sizes = [1, 32], strides = [1, 1]} : vector<1x64xf32> to vector<1x32xf32>
    %69 = vector.extract_strided_slice %41 {offsets = [0, 32], sizes = [1, 32], strides = [1, 1]} : vector<1x64xf32> to vector<1x32xf32>
    %cst_27 = arith.constant dense<0.000000e+00> : vector<4xf32>
    %70 = vector.multi_reduction <add>, %67, %cst_27 [1] : vector<4x32xf32> to vector<4xf32>
    %71 = vector.shape_cast %70 : vector<4xf32> to vector<4x1xf32>
    %cst_28 = arith.constant 3.200000e+01 : f32
    %72 = vector.broadcast %cst_28 : f32 to vector<4x1xf32>
    %73 = arith.divf %71, %72 : vector<4x1xf32>
    %74 = vector.broadcast %73 : vector<4x1xf32> to vector<4x32xf32>
    %75 = arith.subf %67, %74 : vector<4x32xf32>
    %76 = arith.mulf %75, %75 : vector<4x32xf32>
    %cst_29 = arith.constant dense<0.000000e+00> : vector<4xf32>
    %77 = vector.multi_reduction <add>, %76, %cst_29 [1] : vector<4x32xf32> to vector<4xf32>
    %78 = vector.shape_cast %77 : vector<4xf32> to vector<4x1xf32>
    %cst_30 = arith.constant 3.200000e+01 : f32
    %79 = vector.broadcast %cst_30 : f32 to vector<4x1xf32>
    %80 = arith.divf %78, %79 : vector<4x1xf32>
    %81 = vector.broadcast %73 : vector<4x1xf32> to vector<4x32xf32>
    %82 = arith.subf %67, %81 : vector<4x32xf32>
    %cst_31 = arith.constant 9.99999974E-6 : f32
    %83 = vector.broadcast %cst_31 : f32 to vector<4x1xf32>
    %84 = arith.addf %80, %83 : vector<4x1xf32>
    %85 = math.rsqrt %84 : vector<4x1xf32>
    %86 = vector.broadcast %85 : vector<4x1xf32> to vector<4x32xf32>
    %87 = arith.mulf %82, %86 : vector<4x32xf32>
    %88 = vector.broadcast %68 : vector<1x32xf32> to vector<4x32xf32>
    %89 = arith.mulf %87, %88 : vector<4x32xf32>
    %90 = vector.broadcast %69 : vector<1x32xf32> to vector<4x32xf32>
    %91 = arith.addf %89, %90 : vector<4x32xf32>
    %92 = tpu.concatenate %66, %91, %31 in 1 : vector<4x32xf32>, vector<4x32xf32>, vector<4x32xf32> -> vector<4x96xf32>
    %c0_32 = arith.constant 0 : index
    %c0_33 = arith.constant 0 : index
    %93 = vector.load %arg4[%c0_32, %c0_33] : memref<96x256xf32, #tpu.memory_space<vmem>>, vector<96x256xf32>
    %cst_34 = arith.constant dense<0.000000e+00> : vector<4x256xf32>
    %94 = tpu.matmul %92, %93, %cst_34 {dimension_numbers = #tpu.dot_dimension_numbers<[1], [0], [0], [1], [0, 0, 1, 1], [], []>} : vector<4x96xf32>, vector<96x256xf32>, vector<4x256xf32> -> vector<4x256xf32>
    %c6 = arith.constant 6 : index
    %c0_35 = arith.constant 0 : index
    %95 = vector.load %arg7[%c6, %c0_35] : memref<18x256xf32, #tpu.memory_space<vmem>>, vector<1x256xf32>
    %96 = vector.broadcast %95 : vector<1x256xf32> to vector<4x256xf32>
    %97 = arith.addf %94, %96 : vector<4x256xf32>
    %98 = arith.negf %97 : vector<4x256xf32>
    %99 = math.exp %98 : vector<4x256xf32>
    %cst_36 = arith.constant 1.000000e+00 : f32
    %100 = vector.broadcast %cst_36 : f32 to vector<4x256xf32>
    %101 = arith.addf %100, %99 : vector<4x256xf32>
    %102 = arith.divf %100, %101 : vector<4x256xf32>
    %103 = vector.extract_strided_slice %102 {offsets = [0, 0], sizes = [4, 96], strides = [1, 1]} : vector<4x256xf32> to vector<4x96xf32>
    %104 = vector.extract_strided_slice %102 {offsets = [0, 128], sizes = [4, 96], strides = [1, 1]} : vector<4x256xf32> to vector<4x96xf32>
    %105 = vector.extract_strided_slice %104 {offsets = [0, 0], sizes = [4, 32], strides = [1, 1]} : vector<4x96xf32> to vector<4x32xf32>
    %106 = vector.extract_strided_slice %104 {offsets = [0, 32], sizes = [4, 32], strides = [1, 1]} : vector<4x96xf32> to vector<4x32xf32>
    %107 = vector.extract_strided_slice %104 {offsets = [0, 64], sizes = [4, 32], strides = [1, 1]} : vector<4x96xf32> to vector<4x32xf32>
    %108 = arith.mulf %105, %105 : vector<4x32xf32>
    %cst_37 = arith.constant dense<0.000000e+00> : vector<4xf32>
    %109 = vector.multi_reduction <add>, %108, %cst_37 [1] : vector<4x32xf32> to vector<4xf32>
    %110 = vector.shape_cast %109 : vector<4xf32> to vector<4x1xf32>
    %cst_38 = arith.constant 2.500000e-01 : f32
    %111 = vector.broadcast %cst_38 : f32 to vector<4x1xf32>
    %112 = arith.mulf %110, %111 : vector<4x1xf32>
    %113 = arith.mulf %105, %106 : vector<4x32xf32>
    %cst_39 = arith.constant dense<0.000000e+00> : vector<4xf32>
    %114 = vector.multi_reduction <add>, %113, %cst_39 [1] : vector<4x32xf32> to vector<4xf32>
    %115 = vector.shape_cast %114 : vector<4xf32> to vector<4x1xf32>
    %cst_40 = arith.constant 2.500000e-01 : f32
    %116 = vector.broadcast %cst_40 : f32 to vector<4x1xf32>
    %117 = arith.mulf %115, %116 : vector<4x1xf32>
    %118 = arith.mulf %105, %107 : vector<4x32xf32>
    %cst_41 = arith.constant dense<0.000000e+00> : vector<4xf32>
    %119 = vector.multi_reduction <add>, %118, %cst_41 [1] : vector<4x32xf32> to vector<4xf32>
    %120 = vector.shape_cast %119 : vector<4xf32> to vector<4x1xf32>
    %cst_42 = arith.constant 2.500000e-01 : f32
    %121 = vector.broadcast %cst_42 : f32 to vector<4x1xf32>
    %122 = arith.mulf %120, %121 : vector<4x1xf32>
    %123 = arith.maximumf %112, %117 : vector<4x1xf32>
    %124 = arith.maximumf %123, %122 : vector<4x1xf32>
    %125 = arith.subf %112, %124 : vector<4x1xf32>
    %126 = math.exp %125 : vector<4x1xf32>
    %127 = arith.subf %117, %124 : vector<4x1xf32>
    %128 = math.exp %127 : vector<4x1xf32>
    %129 = arith.subf %122, %124 : vector<4x1xf32>
    %130 = math.exp %129 : vector<4x1xf32>
    %131 = arith.addf %126, %128 : vector<4x1xf32>
    %132 = arith.addf %131, %130 : vector<4x1xf32>
    %133 = vector.broadcast %126 : vector<4x1xf32> to vector<4x32xf32>
    %134 = arith.mulf %133, %105 : vector<4x32xf32>
    %135 = vector.broadcast %128 : vector<4x1xf32> to vector<4x32xf32>
    %136 = arith.mulf %135, %106 : vector<4x32xf32>
    %137 = arith.addf %134, %136 : vector<4x32xf32>
    %138 = vector.broadcast %130 : vector<4x1xf32> to vector<4x32xf32>
    %139 = arith.mulf %138, %107 : vector<4x32xf32>
    %140 = arith.addf %137, %139 : vector<4x32xf32>
    %141 = vector.broadcast %132 : vector<4x1xf32> to vector<4x32xf32>
    %142 = arith.divf %140, %141 : vector<4x32xf32>
    %143 = arith.mulf %106, %105 : vector<4x32xf32>
    %cst_43 = arith.constant dense<0.000000e+00> : vector<4xf32>
    %144 = vector.multi_reduction <add>, %143, %cst_43 [1] : vector<4x32xf32> to vector<4xf32>
    %145 = vector.shape_cast %144 : vector<4xf32> to vector<4x1xf32>
    %cst_44 = arith.constant 2.500000e-01 : f32
    %146 = vector.broadcast %cst_44 : f32 to vector<4x1xf32>
    %147 = arith.mulf %145, %146 : vector<4x1xf32>
    %148 = arith.mulf %106, %106 : vector<4x32xf32>
    %cst_45 = arith.constant dense<0.000000e+00> : vector<4xf32>
    %149 = vector.multi_reduction <add>, %148, %cst_45 [1] : vector<4x32xf32> to vector<4xf32>
    %150 = vector.shape_cast %149 : vector<4xf32> to vector<4x1xf32>
    %cst_46 = arith.constant 2.500000e-01 : f32
    %151 = vector.broadcast %cst_46 : f32 to vector<4x1xf32>
    %152 = arith.mulf %150, %151 : vector<4x1xf32>
    %153 = arith.mulf %106, %107 : vector<4x32xf32>
    %cst_47 = arith.constant dense<0.000000e+00> : vector<4xf32>
    %154 = vector.multi_reduction <add>, %153, %cst_47 [1] : vector<4x32xf32> to vector<4xf32>
    %155 = vector.shape_cast %154 : vector<4xf32> to vector<4x1xf32>
    %cst_48 = arith.constant 2.500000e-01 : f32
    %156 = vector.broadcast %cst_48 : f32 to vector<4x1xf32>
    %157 = arith.mulf %155, %156 : vector<4x1xf32>
    %158 = arith.maximumf %147, %152 : vector<4x1xf32>
    %159 = arith.maximumf %158, %157 : vector<4x1xf32>
    %160 = arith.subf %147, %159 : vector<4x1xf32>
    %161 = math.exp %160 : vector<4x1xf32>
    %162 = arith.subf %152, %159 : vector<4x1xf32>
    %163 = math.exp %162 : vector<4x1xf32>
    %164 = arith.subf %157, %159 : vector<4x1xf32>
    %165 = math.exp %164 : vector<4x1xf32>
    %166 = arith.addf %161, %163 : vector<4x1xf32>
    %167 = arith.addf %166, %165 : vector<4x1xf32>
    %168 = vector.broadcast %161 : vector<4x1xf32> to vector<4x32xf32>
    %169 = arith.mulf %168, %105 : vector<4x32xf32>
    %170 = vector.broadcast %163 : vector<4x1xf32> to vector<4x32xf32>
    %171 = arith.mulf %170, %106 : vector<4x32xf32>
    %172 = arith.addf %169, %171 : vector<4x32xf32>
    %173 = vector.broadcast %165 : vector<4x1xf32> to vector<4x32xf32>
    %174 = arith.mulf %173, %107 : vector<4x32xf32>
    %175 = arith.addf %172, %174 : vector<4x32xf32>
    %176 = vector.broadcast %167 : vector<4x1xf32> to vector<4x32xf32>
    %177 = arith.divf %175, %176 : vector<4x32xf32>
    %178 = arith.mulf %107, %105 : vector<4x32xf32>
    %cst_49 = arith.constant dense<0.000000e+00> : vector<4xf32>
    %179 = vector.multi_reduction <add>, %178, %cst_49 [1] : vector<4x32xf32> to vector<4xf32>
    %180 = vector.shape_cast %179 : vector<4xf32> to vector<4x1xf32>
    %cst_50 = arith.constant 2.500000e-01 : f32
    %181 = vector.broadcast %cst_50 : f32 to vector<4x1xf32>
    %182 = arith.mulf %180, %181 : vector<4x1xf32>
    %183 = arith.mulf %107, %106 : vector<4x32xf32>
    %cst_51 = arith.constant dense<0.000000e+00> : vector<4xf32>
    %184 = vector.multi_reduction <add>, %183, %cst_51 [1] : vector<4x32xf32> to vector<4xf32>
    %185 = vector.shape_cast %184 : vector<4xf32> to vector<4x1xf32>
    %cst_52 = arith.constant 2.500000e-01 : f32
    %186 = vector.broadcast %cst_52 : f32 to vector<4x1xf32>
    %187 = arith.mulf %185, %186 : vector<4x1xf32>
    %188 = arith.mulf %107, %107 : vector<4x32xf32>
    %cst_53 = arith.constant dense<0.000000e+00> : vector<4xf32>
    %189 = vector.multi_reduction <add>, %188, %cst_53 [1] : vector<4x32xf32> to vector<4xf32>
    %190 = vector.shape_cast %189 : vector<4xf32> to vector<4x1xf32>
    %cst_54 = arith.constant 2.500000e-01 : f32
    %191 = vector.broadcast %cst_54 : f32 to vector<4x1xf32>
    %192 = arith.mulf %190, %191 : vector<4x1xf32>
    %193 = arith.maximumf %182, %187 : vector<4x1xf32>
    %194 = arith.maximumf %193, %192 : vector<4x1xf32>
    %195 = arith.subf %182, %194 : vector<4x1xf32>
    %196 = math.exp %195 : vector<4x1xf32>
    %197 = arith.subf %187, %194 : vector<4x1xf32>
    %198 = math.exp %197 : vector<4x1xf32>
    %199 = arith.subf %192, %194 : vector<4x1xf32>
    %200 = math.exp %199 : vector<4x1xf32>
    %201 = arith.addf %196, %198 : vector<4x1xf32>
    %202 = arith.addf %201, %200 : vector<4x1xf32>
    %203 = vector.broadcast %196 : vector<4x1xf32> to vector<4x32xf32>
    %204 = arith.mulf %203, %105 : vector<4x32xf32>
    %205 = vector.broadcast %198 : vector<4x1xf32> to vector<4x32xf32>
    %206 = arith.mulf %205, %106 : vector<4x32xf32>
    %207 = arith.addf %204, %206 : vector<4x32xf32>
    %208 = vector.broadcast %200 : vector<4x1xf32> to vector<4x32xf32>
    %209 = arith.mulf %208, %107 : vector<4x32xf32>
    %210 = arith.addf %207, %209 : vector<4x32xf32>
    %211 = vector.broadcast %202 : vector<4x1xf32> to vector<4x32xf32>
    %212 = arith.divf %210, %211 : vector<4x32xf32>
    %213 = tpu.concatenate %142, %177, %212 in 1 : vector<4x32xf32>, vector<4x32xf32>, vector<4x32xf32> -> vector<4x96xf32>
    %c0_55 = arith.constant 0 : index
    %c0_56 = arith.constant 0 : index
    %c0_57 = arith.constant 0 : index
    %214 = vector.load %arg5[%c0_55, %c0_56, %c0_57] : memref<3x96x96xf32, #tpu.memory_space<vmem>>, vector<1x96x96xf32>
    %215 = vector.shape_cast %214 : vector<1x96x96xf32> to vector<96x96xf32>
    %cst_58 = arith.constant dense<0.000000e+00> : vector<4x96xf32>
    %216 = tpu.matmul %213, %215, %cst_58 {dimension_numbers = #tpu.dot_dimension_numbers<[1], [0], [0], [1], [0, 0, 1, 1], [], []>} : vector<4x96xf32>, vector<96x96xf32>, vector<4x96xf32> -> vector<4x96xf32>
    %c7 = arith.constant 7 : index
    %c0_59 = arith.constant 0 : index
    %217 = vector.load %arg7[%c7, %c0_59] : memref<18x256xf32, #tpu.memory_space<vmem>>, vector<1x96xf32>
    %218 = vector.broadcast %217 : vector<1x96xf32> to vector<4x96xf32>
    %219 = arith.addf %216, %218 : vector<4x96xf32>
    %220 = vector.extract_strided_slice %219 {offsets = [0, 0], sizes = [4, 32], strides = [1, 1]} : vector<4x96xf32> to vector<4x32xf32>
    %221 = vector.extract_strided_slice %105 {offsets = [0, 0], sizes = [1, 32], strides = [1, 1]} : vector<4x32xf32> to vector<1x32xf32>
    %222 = vector.broadcast %221 : vector<1x32xf32> to vector<4x32xf32>
    %223 = arith.addf %220, %222 : vector<4x32xf32>
    %224 = vector.extract_strided_slice %219 {offsets = [0, 32], sizes = [4, 32], strides = [1, 1]} : vector<4x96xf32> to vector<4x32xf32>
    %225 = vector.extract_strided_slice %106 {offsets = [1, 0], sizes = [1, 32], strides = [1, 1]} : vector<4x32xf32> to vector<1x32xf32>
    %226 = vector.broadcast %225 : vector<1x32xf32> to vector<4x32xf32>
    %227 = arith.addf %224, %226 : vector<4x32xf32>
    %228 = vector.extract_strided_slice %219 {offsets = [0, 64], sizes = [4, 32], strides = [1, 1]} : vector<4x96xf32> to vector<4x32xf32>
    %229 = vector.extract_strided_slice %107 {offsets = [2, 0], sizes = [1, 32], strides = [1, 1]} : vector<4x32xf32> to vector<1x32xf32>
    %230 = vector.broadcast %229 : vector<1x32xf32> to vector<4x32xf32>
    %231 = arith.addf %228, %230 : vector<4x32xf32>
    %232 = vector.extract_strided_slice %103 {offsets = [0, 0], sizes = [4, 32], strides = [1, 1]} : vector<4x96xf32> to vector<4x32xf32>
    %233 = vector.extract_strided_slice %103 {offsets = [0, 32], sizes = [4, 32], strides = [1, 1]} : vector<4x96xf32> to vector<4x32xf32>
    %234 = vector.extract_strided_slice %103 {offsets = [0, 64], sizes = [4, 32], strides = [1, 1]} : vector<4x96xf32> to vector<4x32xf32>
    %c8 = arith.constant 8 : index
    %c0_60 = arith.constant 0 : index
    %235 = vector.load %arg7[%c8, %c0_60] : memref<18x256xf32, #tpu.memory_space<vmem>>, vector<1x32xf32>
    %c9 = arith.constant 9 : index
    %c0_61 = arith.constant 0 : index
    %236 = vector.load %arg7[%c9, %c0_61] : memref<18x256xf32, #tpu.memory_space<vmem>>, vector<1x32xf32>
    %cst_62 = arith.constant dense<0.000000e+00> : vector<4xf32>
    %237 = vector.multi_reduction <add>, %232, %cst_62 [1] : vector<4x32xf32> to vector<4xf32>
    %238 = vector.shape_cast %237 : vector<4xf32> to vector<4x1xf32>
    %cst_63 = arith.constant 3.200000e+01 : f32
    %239 = vector.broadcast %cst_63 : f32 to vector<4x1xf32>
    %240 = arith.divf %238, %239 : vector<4x1xf32>
    %241 = vector.broadcast %240 : vector<4x1xf32> to vector<4x32xf32>
    %242 = arith.subf %232, %241 : vector<4x32xf32>
    %243 = arith.mulf %242, %242 : vector<4x32xf32>
    %cst_64 = arith.constant dense<0.000000e+00> : vector<4xf32>
    %244 = vector.multi_reduction <add>, %243, %cst_64 [1] : vector<4x32xf32> to vector<4xf32>
    %245 = vector.shape_cast %244 : vector<4xf32> to vector<4x1xf32>
    %cst_65 = arith.constant 3.200000e+01 : f32
    %246 = vector.broadcast %cst_65 : f32 to vector<4x1xf32>
    %247 = arith.divf %245, %246 : vector<4x1xf32>
    %248 = vector.broadcast %240 : vector<4x1xf32> to vector<4x32xf32>
    %249 = arith.subf %232, %248 : vector<4x32xf32>
    %cst_66 = arith.constant 9.99999974E-6 : f32
    %250 = vector.broadcast %cst_66 : f32 to vector<4x1xf32>
    %251 = arith.addf %247, %250 : vector<4x1xf32>
    %252 = math.rsqrt %251 : vector<4x1xf32>
    %253 = vector.broadcast %252 : vector<4x1xf32> to vector<4x32xf32>
    %254 = arith.mulf %249, %253 : vector<4x32xf32>
    %255 = vector.broadcast %235 : vector<1x32xf32> to vector<4x32xf32>
    %256 = arith.mulf %254, %255 : vector<4x32xf32>
    %257 = vector.broadcast %236 : vector<1x32xf32> to vector<4x32xf32>
    %258 = arith.addf %256, %257 : vector<4x32xf32>
    %cst_67 = arith.constant dense<0.000000e+00> : vector<4xf32>
    %259 = vector.multi_reduction <add>, %233, %cst_67 [1] : vector<4x32xf32> to vector<4xf32>
    %260 = vector.shape_cast %259 : vector<4xf32> to vector<4x1xf32>
    %cst_68 = arith.constant 3.200000e+01 : f32
    %261 = vector.broadcast %cst_68 : f32 to vector<4x1xf32>
    %262 = arith.divf %260, %261 : vector<4x1xf32>
    %263 = vector.broadcast %262 : vector<4x1xf32> to vector<4x32xf32>
    %264 = arith.subf %233, %263 : vector<4x32xf32>
    %265 = arith.mulf %264, %264 : vector<4x32xf32>
    %cst_69 = arith.constant dense<0.000000e+00> : vector<4xf32>
    %266 = vector.multi_reduction <add>, %265, %cst_69 [1] : vector<4x32xf32> to vector<4xf32>
    %267 = vector.shape_cast %266 : vector<4xf32> to vector<4x1xf32>
    %cst_70 = arith.constant 3.200000e+01 : f32
    %268 = vector.broadcast %cst_70 : f32 to vector<4x1xf32>
    %269 = arith.divf %267, %268 : vector<4x1xf32>
    %270 = vector.broadcast %262 : vector<4x1xf32> to vector<4x32xf32>
    %271 = arith.subf %233, %270 : vector<4x32xf32>
    %cst_71 = arith.constant 9.99999974E-6 : f32
    %272 = vector.broadcast %cst_71 : f32 to vector<4x1xf32>
    %273 = arith.addf %269, %272 : vector<4x1xf32>
    %274 = math.rsqrt %273 : vector<4x1xf32>
    %275 = vector.broadcast %274 : vector<4x1xf32> to vector<4x32xf32>
    %276 = arith.mulf %271, %275 : vector<4x32xf32>
    %277 = vector.broadcast %235 : vector<1x32xf32> to vector<4x32xf32>
    %278 = arith.mulf %276, %277 : vector<4x32xf32>
    %279 = vector.broadcast %236 : vector<1x32xf32> to vector<4x32xf32>
    %280 = arith.addf %278, %279 : vector<4x32xf32>
    %cst_72 = arith.constant dense<0.000000e+00> : vector<4xf32>
    %281 = vector.multi_reduction <add>, %234, %cst_72 [1] : vector<4x32xf32> to vector<4xf32>
    %282 = vector.shape_cast %281 : vector<4xf32> to vector<4x1xf32>
    %cst_73 = arith.constant 3.200000e+01 : f32
    %283 = vector.broadcast %cst_73 : f32 to vector<4x1xf32>
    %284 = arith.divf %282, %283 : vector<4x1xf32>
    %285 = vector.broadcast %284 : vector<4x1xf32> to vector<4x32xf32>
    %286 = arith.subf %234, %285 : vector<4x32xf32>
    %287 = arith.mulf %286, %286 : vector<4x32xf32>
    %cst_74 = arith.constant dense<0.000000e+00> : vector<4xf32>
    %288 = vector.multi_reduction <add>, %287, %cst_74 [1] : vector<4x32xf32> to vector<4xf32>
    %289 = vector.shape_cast %288 : vector<4xf32> to vector<4x1xf32>
    %cst_75 = arith.constant 3.200000e+01 : f32
    %290 = vector.broadcast %cst_75 : f32 to vector<4x1xf32>
    %291 = arith.divf %289, %290 : vector<4x1xf32>
    %292 = vector.broadcast %284 : vector<4x1xf32> to vector<4x32xf32>
    %293 = arith.subf %234, %292 : vector<4x32xf32>
    %cst_76 = arith.constant 9.99999974E-6 : f32
    %294 = vector.broadcast %cst_76 : f32 to vector<4x1xf32>
    %295 = arith.addf %291, %294 : vector<4x1xf32>
    %296 = math.rsqrt %295 : vector<4x1xf32>
    %297 = vector.broadcast %296 : vector<4x1xf32> to vector<4x32xf32>
    %298 = arith.mulf %293, %297 : vector<4x32xf32>
    %299 = vector.broadcast %235 : vector<1x32xf32> to vector<4x32xf32>
    %300 = arith.mulf %298, %299 : vector<4x32xf32>
    %301 = vector.broadcast %236 : vector<1x32xf32> to vector<4x32xf32>
    %302 = arith.addf %300, %301 : vector<4x32xf32>
    %303 = arith.mulf %223, %258 : vector<4x32xf32>
    %cst_77 = arith.constant dense<0.000000e+00> : vector<4xf32>
    %304 = vector.multi_reduction <add>, %303, %cst_77 [1] : vector<4x32xf32> to vector<4xf32>
    %305 = vector.shape_cast %304 : vector<4xf32> to vector<4x1xf32>
    %cst_78 = arith.constant 5.000000e-01 : f32
    %306 = vector.broadcast %cst_78 : f32 to vector<4x1xf32>
    %307 = arith.mulf %305, %306 : vector<4x1xf32>
    %308 = arith.mulf %223, %280 : vector<4x32xf32>
    %cst_79 = arith.constant dense<0.000000e+00> : vector<4xf32>
    %309 = vector.multi_reduction <add>, %308, %cst_79 [1] : vector<4x32xf32> to vector<4xf32>
    %310 = vector.shape_cast %309 : vector<4xf32> to vector<4x1xf32>
    %cst_80 = arith.constant 5.000000e-01 : f32
    %311 = vector.broadcast %cst_80 : f32 to vector<4x1xf32>
    %312 = arith.mulf %310, %311 : vector<4x1xf32>
    %313 = arith.mulf %223, %302 : vector<4x32xf32>
    %cst_81 = arith.constant dense<0.000000e+00> : vector<4xf32>
    %314 = vector.multi_reduction <add>, %313, %cst_81 [1] : vector<4x32xf32> to vector<4xf32>
    %315 = vector.shape_cast %314 : vector<4xf32> to vector<4x1xf32>
    %cst_82 = arith.constant 5.000000e-01 : f32
    %316 = vector.broadcast %cst_82 : f32 to vector<4x1xf32>
    %317 = arith.mulf %315, %316 : vector<4x1xf32>
    %318 = arith.maximumf %307, %312 : vector<4x1xf32>
    %319 = arith.maximumf %318, %317 : vector<4x1xf32>
    %320 = arith.subf %307, %319 : vector<4x1xf32>
    %321 = math.exp %320 : vector<4x1xf32>
    %322 = arith.subf %312, %319 : vector<4x1xf32>
    %323 = math.exp %322 : vector<4x1xf32>
    %324 = arith.subf %317, %319 : vector<4x1xf32>
    %325 = math.exp %324 : vector<4x1xf32>
    %326 = arith.addf %321, %323 : vector<4x1xf32>
    %327 = arith.addf %326, %325 : vector<4x1xf32>
    %328 = vector.broadcast %321 : vector<4x1xf32> to vector<4x32xf32>
    %329 = arith.mulf %328, %258 : vector<4x32xf32>
    %330 = vector.broadcast %323 : vector<4x1xf32> to vector<4x32xf32>
    %331 = arith.mulf %330, %280 : vector<4x32xf32>
    %332 = arith.addf %329, %331 : vector<4x32xf32>
    %333 = vector.broadcast %325 : vector<4x1xf32> to vector<4x32xf32>
    %334 = arith.mulf %333, %302 : vector<4x32xf32>
    %335 = arith.addf %332, %334 : vector<4x32xf32>
    %336 = vector.broadcast %327 : vector<4x1xf32> to vector<4x32xf32>
    %337 = arith.divf %335, %336 : vector<4x32xf32>
    %338 = arith.mulf %227, %258 : vector<4x32xf32>
    %cst_83 = arith.constant dense<0.000000e+00> : vector<4xf32>
    %339 = vector.multi_reduction <add>, %338, %cst_83 [1] : vector<4x32xf32> to vector<4xf32>
    %340 = vector.shape_cast %339 : vector<4xf32> to vector<4x1xf32>
    %cst_84 = arith.constant 5.000000e-01 : f32
    %341 = vector.broadcast %cst_84 : f32 to vector<4x1xf32>
    %342 = arith.mulf %340, %341 : vector<4x1xf32>
    %343 = arith.mulf %227, %280 : vector<4x32xf32>
    %cst_85 = arith.constant dense<0.000000e+00> : vector<4xf32>
    %344 = vector.multi_reduction <add>, %343, %cst_85 [1] : vector<4x32xf32> to vector<4xf32>
    %345 = vector.shape_cast %344 : vector<4xf32> to vector<4x1xf32>
    %cst_86 = arith.constant 5.000000e-01 : f32
    %346 = vector.broadcast %cst_86 : f32 to vector<4x1xf32>
    %347 = arith.mulf %345, %346 : vector<4x1xf32>
    %348 = arith.mulf %227, %302 : vector<4x32xf32>
    %cst_87 = arith.constant dense<0.000000e+00> : vector<4xf32>
    %349 = vector.multi_reduction <add>, %348, %cst_87 [1] : vector<4x32xf32> to vector<4xf32>
    %350 = vector.shape_cast %349 : vector<4xf32> to vector<4x1xf32>
    %cst_88 = arith.constant 5.000000e-01 : f32
    %351 = vector.broadcast %cst_88 : f32 to vector<4x1xf32>
    %352 = arith.mulf %350, %351 : vector<4x1xf32>
    %353 = arith.maximumf %342, %347 : vector<4x1xf32>
    %354 = arith.maximumf %353, %352 : vector<4x1xf32>
    %355 = arith.subf %342, %354 : vector<4x1xf32>
    %356 = math.exp %355 : vector<4x1xf32>
    %357 = arith.subf %347, %354 : vector<4x1xf32>
    %358 = math.exp %357 : vector<4x1xf32>
    %359 = arith.subf %352, %354 : vector<4x1xf32>
    %360 = math.exp %359 : vector<4x1xf32>
    %361 = arith.addf %356, %358 : vector<4x1xf32>
    %362 = arith.addf %361, %360 : vector<4x1xf32>
    %363 = vector.broadcast %356 : vector<4x1xf32> to vector<4x32xf32>
    %364 = arith.mulf %363, %258 : vector<4x32xf32>
    %365 = vector.broadcast %358 : vector<4x1xf32> to vector<4x32xf32>
    %366 = arith.mulf %365, %280 : vector<4x32xf32>
    %367 = arith.addf %364, %366 : vector<4x32xf32>
    %368 = vector.broadcast %360 : vector<4x1xf32> to vector<4x32xf32>
    %369 = arith.mulf %368, %302 : vector<4x32xf32>
    %370 = arith.addf %367, %369 : vector<4x32xf32>
    %371 = vector.broadcast %362 : vector<4x1xf32> to vector<4x32xf32>
    %372 = arith.divf %370, %371 : vector<4x32xf32>
    %373 = arith.mulf %231, %258 : vector<4x32xf32>
    %cst_89 = arith.constant dense<0.000000e+00> : vector<4xf32>
    %374 = vector.multi_reduction <add>, %373, %cst_89 [1] : vector<4x32xf32> to vector<4xf32>
    %375 = vector.shape_cast %374 : vector<4xf32> to vector<4x1xf32>
    %cst_90 = arith.constant 5.000000e-01 : f32
    %376 = vector.broadcast %cst_90 : f32 to vector<4x1xf32>
    %377 = arith.mulf %375, %376 : vector<4x1xf32>
    %378 = arith.mulf %231, %280 : vector<4x32xf32>
    %cst_91 = arith.constant dense<0.000000e+00> : vector<4xf32>
    %379 = vector.multi_reduction <add>, %378, %cst_91 [1] : vector<4x32xf32> to vector<4xf32>
    %380 = vector.shape_cast %379 : vector<4xf32> to vector<4x1xf32>
    %cst_92 = arith.constant 5.000000e-01 : f32
    %381 = vector.broadcast %cst_92 : f32 to vector<4x1xf32>
    %382 = arith.mulf %380, %381 : vector<4x1xf32>
    %383 = arith.mulf %231, %302 : vector<4x32xf32>
    %cst_93 = arith.constant dense<0.000000e+00> : vector<4xf32>
    %384 = vector.multi_reduction <add>, %383, %cst_93 [1] : vector<4x32xf32> to vector<4xf32>
    %385 = vector.shape_cast %384 : vector<4xf32> to vector<4x1xf32>
    %cst_94 = arith.constant 5.000000e-01 : f32
    %386 = vector.broadcast %cst_94 : f32 to vector<4x1xf32>
    %387 = arith.mulf %385, %386 : vector<4x1xf32>
    %388 = arith.maximumf %377, %382 : vector<4x1xf32>
    %389 = arith.maximumf %388, %387 : vector<4x1xf32>
    %390 = arith.subf %377, %389 : vector<4x1xf32>
    %391 = math.exp %390 : vector<4x1xf32>
    %392 = arith.subf %382, %389 : vector<4x1xf32>
    %393 = math.exp %392 : vector<4x1xf32>
    %394 = arith.subf %387, %389 : vector<4x1xf32>
    %395 = math.exp %394 : vector<4x1xf32>
    %396 = arith.addf %391, %393 : vector<4x1xf32>
    %397 = arith.addf %396, %395 : vector<4x1xf32>
    %398 = vector.broadcast %391 : vector<4x1xf32> to vector<4x32xf32>
    %399 = arith.mulf %398, %258 : vector<4x32xf32>
    %400 = vector.broadcast %393 : vector<4x1xf32> to vector<4x32xf32>
    %401 = arith.mulf %400, %280 : vector<4x32xf32>
    %402 = arith.addf %399, %401 : vector<4x32xf32>
    %403 = vector.broadcast %395 : vector<4x1xf32> to vector<4x32xf32>
    %404 = arith.mulf %403, %302 : vector<4x32xf32>
    %405 = arith.addf %402, %404 : vector<4x32xf32>
    %406 = vector.broadcast %397 : vector<4x1xf32> to vector<4x32xf32>
    %407 = arith.divf %405, %406 : vector<4x32xf32>
    %408 = tpu.concatenate %337, %372, %407 in 1 : vector<4x32xf32>, vector<4x32xf32>, vector<4x32xf32> -> vector<4x96xf32>
    %c1_95 = arith.constant 1 : index
    %c0_96 = arith.constant 0 : index
    %c0_97 = arith.constant 0 : index
    %409 = vector.load %arg5[%c1_95, %c0_96, %c0_97] : memref<3x96x96xf32, #tpu.memory_space<vmem>>, vector<1x96x96xf32>
    %410 = vector.shape_cast %409 : vector<1x96x96xf32> to vector<96x96xf32>
    %cst_98 = arith.constant dense<0.000000e+00> : vector<4x96xf32>
    %411 = tpu.matmul %408, %410, %cst_98 {dimension_numbers = #tpu.dot_dimension_numbers<[1], [0], [0], [1], [0, 0, 1, 1], [], []>} : vector<4x96xf32>, vector<96x96xf32>, vector<4x96xf32> -> vector<4x96xf32>
    %c10 = arith.constant 10 : index
    %c0_99 = arith.constant 0 : index
    %412 = vector.load %arg7[%c10, %c0_99] : memref<18x256xf32, #tpu.memory_space<vmem>>, vector<1x96xf32>
    %413 = vector.broadcast %412 : vector<1x96xf32> to vector<4x96xf32>
    %414 = arith.addf %411, %413 : vector<4x96xf32>
    %415 = arith.addf %103, %414 : vector<4x96xf32>
    %416 = vector.extract_strided_slice %415 {offsets = [0, 0], sizes = [4, 32], strides = [1, 1]} : vector<4x96xf32> to vector<4x32xf32>
    %417 = vector.extract_strided_slice %415 {offsets = [0, 32], sizes = [4, 32], strides = [1, 1]} : vector<4x96xf32> to vector<4x32xf32>
    %418 = vector.extract_strided_slice %415 {offsets = [0, 64], sizes = [4, 32], strides = [1, 1]} : vector<4x96xf32> to vector<4x32xf32>
    %419 = tpu.concatenate %416, %417, %418 in 0 : vector<4x32xf32>, vector<4x32xf32>, vector<4x32xf32> -> vector<12x32xf32>
    %c11 = arith.constant 11 : index
    %c0_100 = arith.constant 0 : index
    %420 = vector.load %arg7[%c11, %c0_100] : memref<18x256xf32, #tpu.memory_space<vmem>>, vector<1x32xf32>
    %c12 = arith.constant 12 : index
    %c0_101 = arith.constant 0 : index
    %421 = vector.load %arg7[%c12, %c0_101] : memref<18x256xf32, #tpu.memory_space<vmem>>, vector<1x32xf32>
    %cst_102 = arith.constant dense<0.000000e+00> : vector<12xf32>
    %422 = vector.multi_reduction <add>, %419, %cst_102 [1] : vector<12x32xf32> to vector<12xf32>
    %423 = vector.shape_cast %422 : vector<12xf32> to vector<12x1xf32>
    %cst_103 = arith.constant 3.200000e+01 : f32
    %424 = vector.broadcast %cst_103 : f32 to vector<12x1xf32>
    %425 = arith.divf %423, %424 : vector<12x1xf32>
    %426 = vector.broadcast %425 : vector<12x1xf32> to vector<12x32xf32>
    %427 = arith.subf %419, %426 : vector<12x32xf32>
    %428 = arith.mulf %427, %427 : vector<12x32xf32>
    %cst_104 = arith.constant dense<0.000000e+00> : vector<12xf32>
    %429 = vector.multi_reduction <add>, %428, %cst_104 [1] : vector<12x32xf32> to vector<12xf32>
    %430 = vector.shape_cast %429 : vector<12xf32> to vector<12x1xf32>
    %cst_105 = arith.constant 3.200000e+01 : f32
    %431 = vector.broadcast %cst_105 : f32 to vector<12x1xf32>
    %432 = arith.divf %430, %431 : vector<12x1xf32>
    %433 = vector.broadcast %425 : vector<12x1xf32> to vector<12x32xf32>
    %434 = arith.subf %419, %433 : vector<12x32xf32>
    %cst_106 = arith.constant 9.99999974E-6 : f32
    %435 = vector.broadcast %cst_106 : f32 to vector<12x1xf32>
    %436 = arith.addf %432, %435 : vector<12x1xf32>
    %437 = math.rsqrt %436 : vector<12x1xf32>
    %438 = vector.broadcast %437 : vector<12x1xf32> to vector<12x32xf32>
    %439 = arith.mulf %434, %438 : vector<12x32xf32>
    %440 = vector.broadcast %420 : vector<1x32xf32> to vector<12x32xf32>
    %441 = arith.mulf %439, %440 : vector<12x32xf32>
    %442 = vector.broadcast %421 : vector<1x32xf32> to vector<12x32xf32>
    %443 = arith.addf %441, %442 : vector<12x32xf32>
    %c0_107 = arith.constant 0 : index
    %c0_108 = arith.constant 0 : index
    %444 = vector.load %arg6[%c0_107, %c0_108] : memref<160x128xf32, #tpu.memory_space<vmem>>, vector<32x128xf32>
    %cst_109 = arith.constant dense<0.000000e+00> : vector<12x128xf32>
    %445 = tpu.matmul %443, %444, %cst_109 {dimension_numbers = #tpu.dot_dimension_numbers<[1], [0], [0], [1], [0, 0, 1, 1], [], []>} : vector<12x32xf32>, vector<32x128xf32>, vector<12x128xf32> -> vector<12x128xf32>
    %c13 = arith.constant 13 : index
    %c0_110 = arith.constant 0 : index
    %446 = vector.load %arg7[%c13, %c0_110] : memref<18x256xf32, #tpu.memory_space<vmem>>, vector<1x128xf32>
    %447 = vector.broadcast %446 : vector<1x128xf32> to vector<12x128xf32>
    %448 = arith.addf %445, %447 : vector<12x128xf32>
    %449 = arith.mulf %448, %448 : vector<12x128xf32>
    %450 = arith.mulf %448, %449 : vector<12x128xf32>
    %cst_111 = arith.constant 4.471500e-02 : f32
    %451 = vector.broadcast %cst_111 : f32 to vector<12x128xf32>
    %452 = arith.mulf %451, %450 : vector<12x128xf32>
    %453 = arith.addf %448, %452 : vector<12x128xf32>
    %cst_112 = arith.constant 0.797884583 : f32
    %454 = vector.broadcast %cst_112 : f32 to vector<12x128xf32>
    %455 = arith.mulf %454, %453 : vector<12x128xf32>
    %456 = math.tanh %455 : vector<12x128xf32>
    %cst_113 = arith.constant 1.000000e+00 : f32
    %457 = vector.broadcast %cst_113 : f32 to vector<12x128xf32>
    %458 = arith.addf %457, %456 : vector<12x128xf32>
    %cst_114 = arith.constant 5.000000e-01 : f32
    %459 = vector.broadcast %cst_114 : f32 to vector<12x128xf32>
    %460 = arith.mulf %459, %458 : vector<12x128xf32>
    %461 = arith.mulf %448, %460 : vector<12x128xf32>
    %c32 = arith.constant 32 : index
    %c0_115 = arith.constant 0 : index
    %462 = vector.load %arg6[%c32, %c0_115] : memref<160x128xf32, #tpu.memory_space<vmem>>, vector<128x32xf32>
    %cst_116 = arith.constant dense<0.000000e+00> : vector<12x32xf32>
    %463 = tpu.matmul %461, %462, %cst_116 {dimension_numbers = #tpu.dot_dimension_numbers<[1], [0], [0], [1], [0, 0, 1, 1], [], []>} : vector<12x128xf32>, vector<128x32xf32>, vector<12x32xf32> -> vector<12x32xf32>
    %464 = arith.addf %419, %463 : vector<12x32xf32>
    %c14 = arith.constant 14 : index
    %c0_117 = arith.constant 0 : index
    %465 = vector.load %arg7[%c14, %c0_117] : memref<18x256xf32, #tpu.memory_space<vmem>>, vector<1x32xf32>
    %466 = vector.broadcast %465 : vector<1x32xf32> to vector<12x32xf32>
    %467 = arith.addf %464, %466 : vector<12x32xf32>
    %468 = vector.extract_strided_slice %467 {offsets = [0, 0], sizes = [4, 32], strides = [1, 1]} : vector<12x32xf32> to vector<4x32xf32>
    %469 = vector.extract_strided_slice %467 {offsets = [4, 0], sizes = [4, 32], strides = [1, 1]} : vector<12x32xf32> to vector<4x32xf32>
    %470 = vector.extract_strided_slice %467 {offsets = [8, 0], sizes = [4, 32], strides = [1, 1]} : vector<12x32xf32> to vector<4x32xf32>
    %471 = tpu.concatenate %468, %469, %470 in 1 : vector<4x32xf32>, vector<4x32xf32>, vector<4x32xf32> -> vector<4x96xf32>
    %c2_118 = arith.constant 2 : index
    %c0_119 = arith.constant 0 : index
    %c0_120 = arith.constant 0 : index
    %472 = vector.load %arg5[%c2_118, %c0_119, %c0_120] : memref<3x96x96xf32, #tpu.memory_space<vmem>>, vector<1x96x96xf32>
    %473 = vector.shape_cast %472 : vector<1x96x96xf32> to vector<96x96xf32>
    %cst_121 = arith.constant dense<0.000000e+00> : vector<4x96xf32>
    %474 = tpu.matmul %471, %473, %cst_121 {dimension_numbers = #tpu.dot_dimension_numbers<[1], [0], [0], [1], [0, 0, 1, 1], [], []>} : vector<4x96xf32>, vector<96x96xf32>, vector<4x96xf32> -> vector<4x96xf32>
    %c15 = arith.constant 15 : index
    %c0_122 = arith.constant 0 : index
    %475 = vector.load %arg7[%c15, %c0_122] : memref<18x256xf32, #tpu.memory_space<vmem>>, vector<1x96xf32>
    %476 = vector.broadcast %475 : vector<1x96xf32> to vector<4x96xf32>
    %477 = arith.addf %474, %476 : vector<4x96xf32>
    %cst_123 = arith.constant 0.000000e+00 : f32
    %478 = vector.broadcast %cst_123 : f32 to vector<4x96xf32>
    %479 = arith.maximumf %477, %478 : vector<4x96xf32>
    %c16 = arith.constant 16 : index
    %c0_124 = arith.constant 0 : index
    %480 = vector.load %arg7[%c16, %c0_124] : memref<18x256xf32, #tpu.memory_space<vmem>>, vector<1x96xf32>
    %481 = vector.broadcast %480 : vector<1x96xf32> to vector<4x96xf32>
    %482 = arith.mulf %479, %481 : vector<4x96xf32>
    %cst_125 = arith.constant dense<0.000000e+00> : vector<4xf32>
    %483 = vector.multi_reduction <add>, %482, %cst_125 [1] : vector<4x96xf32> to vector<4xf32>
    %484 = vector.shape_cast %483 : vector<4xf32> to vector<4x1xf32>
    %c17 = arith.constant 17 : index
    %c0_126 = arith.constant 0 : index
    %485 = vector.load %arg7[%c17, %c0_126] : memref<18x256xf32, #tpu.memory_space<vmem>>, vector<1x1xf32>
    %486 = vector.broadcast %485 : vector<1x1xf32> to vector<4x1xf32>
    %487 = arith.addf %484, %486 : vector<4x1xf32>
    %c0_127 = arith.constant 0 : index
    %c0_128 = arith.constant 0 : index
    %488 = vector.load %arg8[%c0_127, %c0_128] : memref<4x1xf32, #tpu.memory_space<vmem>>, vector<4x1xf32>
    tpu.vector_store %arg8[%c0_127, %c0_128], %487 {strides = array<i32>} : memref<4x1xf32, #tpu.memory_space<vmem>>, vector<4x1xf32>,
    return
  }
}

</mosaic_0001>

<bundles_post_ra>
// kernel: _misa_forward.1
= control target key start
LH: loop header
LB: loop body
LE: loop exit
PB: predicated region body
PF: predicated region fallthrough
CT: control target
= control target key end

     0   :  { %v2449_v22 = vmov 1983009808   ;;  %v135_v24 = vlaneseq  ;;  %v2450_v42 = vmov 0.0|0.0   ;;  %vm2451_vm0 = vmmov 0   ;;  %s2453_s23 = smov 96   ;;  %s2455_s9 = smov 32   ;;  %s3223_s2 = inlined_call_operand.vmem [shape: bf16[768,32], index: 2, kind: input, shape index: {}]   ;;  %s3224_s0 = inlined_call_operand.vmem [shape: bf16[4,768], index: 0, kind: input, shape index: {}]   ;;  %s3225_s3 = inlined_call_operand.vmem [shape: f32[100,64], index: 3, kind: input, shape index: {}]   ;;  %s3226_s1 = inlined_call_operand.vmem [shape: f32[4,100], index: 1, kind: input, shape index: {}]   ;;  %s3227_s7 = inlined_call_operand.vmem [shape: f32[18,256], index: 7, kind: input, shape index: {}]   ;;  %s3228_s4 = inlined_call_operand.vmem [shape: f32[96,256], index: 4, kind: input, shape index: {}]   ;;  %s3229_s5 = inlined_call_operand.vmem [shape: f32[3,96,96], index: 5, kind: input, shape index: {}]   ;;  %s3230_s6 = inlined_call_operand.vmem [shape: f32[160,128], index: 6, kind: input, shape index: {}]   ;;  %s3231_s8 = inlined_call_operand.vmem [shape: f32[4,1], index: 8, kind: output, shape index: {}]  }
   0x1   :  { %v2324_v0 = vld [vmem:[%s3223_s2 + $0x40] sm:$0xff]   ;;  %v2328_v4 = vld [vmem:[%s3223_s2 + $0x48] sm:$0xff]   ;;  %v2332_v8 = vld [vmem:[%s3223_s2 + $0x50] sm:$0xff]   ;;  %v133_v23 = vunpack.c.l.s4 %v2449_v22  ;;  %v2452_v56 = vmov 0.0   ;;  %vm609_vm1 = vcmask 1043456   ;;  %vm605_vm2 = vcmask 818176  }
   0x2   :  { %v2325_v1 = vld [vmem:[%s3223_s2 + $0xc0] sm:$0xff]   ;;  %1882 = vmatprep.subr.bf16.mxu0 %v2324_v0  ;;  %v2329_v5 = vld [vmem:[%s3223_s2 + $0xc8] sm:$0xff]   ;;  %v2333_v9 = vld [vmem:[%s3223_s2 + $0xd0] sm:$0xff]   ;;  %v2579_v30 = vshrl.u32 %v135_v24, 7  ;;  %vm573_vm3 = vcmask 257024   ;;  %vm728_vm4 = vcmask 261120  }
   0x3   :  { %v2326_v2 = vld [vmem:[%s3223_s2] sm:$0xff]   ;;  %1904 = vmatprep.subr.bf16.mxu1 %v2325_v1  ;;  %v2330_v6 = vld [vmem:[%s3223_s2 + $0x8] sm:$0xff]   ;;  %v2334_v10 = vld [vmem:[%s3223_s2 + $0x10] sm:$0xff]   ;;  %v134_v29 = vunpack.c.0.s8 %v133_v23  ;;  %vm730_vm5 = vcmask 523264   ;;  %vm769_vm6 = vcmask 785408   ;;  %vm1786_vm7 = vcmask 781312  }
   0x4   :  { %v2327_v3 = vld [vmem:[%s3223_s2 + $0x80] sm:$0xff]   ;;  %1883 = vmatpush3.bf16.msra.mxu0 %v2326_v2  ;;  %v2331_v7 = vld [vmem:[%s3223_s2 + $0x88] sm:$0xff]   ;;  %v2335_v11 = vld [vmem:[%s3223_s2 + $0x90] sm:$0xff]   ;;  %vm1792_vm8 = vcmask 3072  }
   0x5   :  { %1905 = vmatpush3.bf16.msra.mxu1 %v2327_v3  ;;  %1884 = vmatprep.subr.bf16.mxu0 %v2328_v4  ;;  %v2336_v12 = vld [vmem:[%s3223_s2 + $0x58] sm:$0xff]   ;;  %v2340_v16 = vld [vmem:[%s3223_s2 + $0x60] sm:$0xff]   ;;  %v2344_v20 = vld [vmem:[%s3223_s2 + $0x68] sm:$0xff]   ;;  %v137_v35 = vsub.s32 %v134_v29, %v2579_v30 }
   0x6   :  { %1906 = vmatprep.subr.bf16.mxu1 %v2329_v5  ;;  %v2337_v13 = vld [vmem:[%s3223_s2 + $0xd8] sm:$0xff]   ;;  %v2341_v17 = vld [vmem:[%s3223_s2 + $0xe0] sm:$0xff]   ;;  %v2345_v21 = vld [vmem:[%s3223_s2 + $0xe8] sm:$0xff]  }
   0x7   :  { %v2338_v14 = vld [vmem:[%s3223_s2 + $0x18] sm:$0xff]   ;;  %v2342_v18 = vld [vmem:[%s3223_s2 + $0x20] sm:$0xff]   ;;  %v2346_v25 = vld [vmem:[%s3223_s2 + $0x28] sm:$0xff]  }
   0x8   :  { %1885 = vmatpush3.bf16.msra.mxu0 %v2330_v6  ;;  %v2339_v15 = vld [vmem:[%s3223_s2 + $0x98] sm:$0xff]   ;;  %v2343_v19 = vld [vmem:[%s3223_s2 + $0xa0] sm:$0xff]   ;;  %v2347_v26 = vld [vmem:[%s3223_s2 + $0xa8] sm:$0xff]  }
   0x9   :  { %1907 = vmatpush3.bf16.msra.mxu1 %v2331_v7  ;;  %1886 = vmatprep.subr.bf16.mxu0 %v2332_v8  ;;  %v2348_v27 = vld [vmem:[%s3223_s2 + $0x70] sm:$0xff]   ;;  %v2352_v33 = vld [vmem:[%s3223_s2 + $0x78] sm:$0xff]   ;;  %v30_v38 = vld [vmem:[%s3224_s0] sm:$0xff] }
   0xa   :  { %1908 = vmatprep.subr.bf16.mxu1 %v2333_v9  ;;  %v2349_v28 = vld [vmem:[%s3223_s2 + $0xf0] sm:$0xff]   ;;  %v2353_v34 = vld [vmem:[%s3223_s2 + $0xf8] sm:$0xff]   ;;  %v138_v39 = vrot.slane %v30_v38, %v137_v35  ;;  %v131_v40 = vcombine.high %v30_v38, %v30_v38  ;;  %v2357_v41 = vld [vmem:[%s3223_s2 + $0x140] sm:$0xff]  }
   0xb   :  { %v2350_v31 = vld [vmem:[%s3223_s2 + $0x30] sm:$0xff]   ;;  %v2354_v36 = vld [vmem:[%s3223_s2 + $0x38] sm:$0xff]   ;;  %v591_v43 = vld [vmem:[%s3225_s3] sm:$0xff] }
   0xc   :  { %1887 = vmatpush3.bf16.msra.mxu0 %v2334_v10  ;;  %v2351_v32 = vld [vmem:[%s3223_s2 + $0xb0] sm:$0xff]   ;;  %v2355_v37 = vld [vmem:[%s3223_s2 + $0xb8] sm:$0xff]   ;;  %v592_v44 = vld [vmem:[%s3225_s3 + $0x8] sm:$0xff]  ;;  %v146_v45 = vcombine.high %v138_v39, %v138_v39  ;;  %v145_v46 = vrot.slane %v131_v40, %v137_v35 }
   0xd   :  { %1909 = vmatpush3.bf16.msra.mxu1 %v2335_v11  ;;  %1888 = vmatprep.subr.bf16.mxu0 %v2336_v12  ;;  %v2358_v47 = vld [vmem:[%s3223_s2 + $0x100] sm:$0xff]   ;;  %v2359_v48 = vld [vmem:[%s3223_s2 + $0x148] sm:$0xff]   ;;  %v2182_v50 = vpack.c.bf16 %v592_v44, %v591_v43  ;;  %v593_v51 = vld [vmem:[%s3225_s3 + $0x10] sm:$0xff] }
   0xe   :  { %1910 = vmatprep.subr.bf16.mxu1 %v2337_v13  ;;  %482 = vmatprep.mubr.bf16.mxu0 %v146_v45  ;;  %v147_v49 = vcombine.high %v145_v46, %v145_v46  ;;  %v594_v52 = vld [vmem:[%s3225_s3 + $0x18] sm:$0xff]  ;;  %v2360_v53 = vld [vmem:[%s3223_s2 + $0x108] sm:$0xff]   ;;  %v2361_v54 = vld [vmem:[%s3223_s2 + $0x150] sm:$0xff]  }
   0xf   :  { %v2185_v55 = vpack.c.bf16 %v594_v52, %v593_v51  ;;  %v595_v57 = vld [vmem:[%s3225_s3 + $0x20] sm:$0xff]  ;;  %v596_v58 = vld [vmem:[%s3225_s3 + $0x28] sm:$0xff]  ;;  %v2362_v59 = vld [vmem:[%s3223_s2 + $0x110] sm:$0xff]  }
  0x10   :  { %1889 = vmatpush3.bf16.msra.mxu0 %v2338_v14  ;;  %522 = vmatprep.mubr.bf16.mxu1 %v147_v49  ;;  %v2363_v60 = vld [vmem:[%s3223_s2 + $0x158] sm:$0xff]   ;;  %v2188_v61 = vpack.c.bf16 %v596_v58, %v595_v57  ;;  %v597_v62 = vld [vmem:[%s3225_s3 + $0x30] sm:$0xff]  ;;  %v2365_v1 = vld [vmem:[%s3223_s2 + $0x160] sm:$0xff]  }
  0x11   :  { %1911 = vmatpush3.bf16.msra.mxu1 %v2339_v15  ;;  %1890 = vmatprep.subr.bf16.mxu0 %v2340_v16  ;;  %v598_v63 = vld [vmem:[%s3225_s3 + $0x38] sm:$0xff]  ;;  %v599_v3 = vld [vmem:[%s3225_s3 + $0x40] sm:$0xff]  ;;  %v600_v4 = vld [vmem:[%s3225_s3 + $0x48] sm:$0xff] }
  0x12   :  { %1912 = vmatprep.subr.bf16.mxu1 %v2341_v17  ;;  %v2364_v0 = vld [vmem:[%s3223_s2 + $0x118] sm:$0xff]   ;;  %v2191_v2 = vpack.c.bf16 %v598_v63, %v597_v62  ;;  %v2366_v5 = vld [vmem:[%s3223_s2 + $0x120] sm:$0xff]   ;;  %v2367_v6 = vld [vmem:[%s3223_s2 + $0x168] sm:$0xff]   ;;  %v2194_v7 = vpack.c.bf16 %v600_v4, %v599_v3 }
  0x13   :  { %v1798_v8 = vld.sshfl [vmem:[%s3224_s0 + $0x8] sm:$0x33 pattern:$0x76325410]  ;;  %v601_v9 = vld [vmem:[%s3225_s3 + $0x50] sm:$0xff]  ;;  %v602_v10 = vld [vmem:[%s3225_s3 + $0x58] sm:$0xff] }
  0x14   :  { %1891 = vmatpush3.bf16.msra.mxu0 %v2342_v18  ;;  %v155_v11 = vcombine.high %v1798_v8, %v1798_v8  ;;  %v2368_v12 = vld [vmem:[%s3223_s2 + $0x128] sm:$0xff]   ;;  %v2369_v13 = vld [vmem:[%s3223_s2 + $0x170] sm:$0xff]   ;;  %v2197_v14 = vpack.c.bf16 %v602_v10, %v601_v9  ;;  %v2371_v16 = vld [vmem:[%s3223_s2 + $0x178] sm:$0xff]  }
  0x15   :  { %1913 = vmatpush3.bf16.msra.mxu1 %v2343_v19  ;;  %1892 = vmatprep.subr.bf16.mxu0 %v2344_v20  ;;  %v2370_v15 = vld [vmem:[%s3223_s2 + $0x130] sm:$0xff]   ;;  %v603_v17 = vld [vmem:[%s3225_s3 + $0x60] sm:$0xf]  ;;  %v2372_v19 = vld [vmem:[%s3223_s2 + $0x138] sm:$0xff]  }
  0x16   :  { %1914 = vmatprep.subr.bf16.mxu1 %v2345_v21  ;;  %v590_v18 = vld [vmem:[%s3226_s1] sm:$0xf]  ;;  %v733_v4 = vld [vmem:[%s3228_s4 + $0x8] sm:$0xff]  ;;  %v739_v10 = vld [vmem:[%s3228_s4 + $0x38] sm:$0xff] }
  0x17   :  { %v128_v21 = vld [vmem:[%s3227_s7] ss:$0 sm:$0xff]  ;;  %v737_v9 = vld [vmem:[%s3228_s4 + $0x28] sm:$0xff] }
  0x18   :  { %1893 = vmatpush3.bf16.msra.mxu0 %v2346_v25 }
  0x19   :  { %1915 = vmatpush3.bf16.msra.mxu1 %v2347_v26  ;;  %1894 = vmatprep.subr.bf16.mxu0 %v2348_v27 }
  0x1a   :  { %1916 = vmatprep.subr.bf16.mxu1 %v2349_v28 }
  0x1c   :  { %1895 = vmatpush3.bf16.msra.mxu0 %v2350_v31 }
  0x1d   :  { %1917 = vmatpush3.bf16.msra.mxu1 %v2351_v32  ;;  %1896 = vmatprep.subr.bf16.mxu0 %v2352_v33 }
  0x1e   :  { %1918 = vmatprep.subr.bf16.mxu1 %v2353_v34  ;;  %v604_v34 = vld [vmem:[%s3227_s7 + $0x3] ss:$0 sm:$0xff] }
  0x20   :  { %1897 = vmatpush3.bf16.msra.mxu0 %v2354_v36 }
  0x21   :  { %1919 = vmatpush3.bf16.msra.mxu1 %v2355_v37  ;;  %1926 = vmatprep.subr.bf16.mxu0 %v2357_v41 }
  0x22   :  { %2181 = vmatprep.subr.bf16.mxu1 %v2450_v42 }
  0x23   :  { %483 = vmatmul.mubr.bf16.vlgmr.msra.gmra.mrb[0].mxu0 %v138_v39 }
  0x24   :  { %1927 = vmatpush3.bf16.msra.mxu0 %v2358_v47  ;;  %523 = vmatmul.mubr.bf16.vlgmr.msra.gmra.mrb[0].mxu1 %v145_v46 }
  0x25   :  { %1928 = vmatprep.subr.bf16.mxu0 %v2359_v48  ;;  %2183 = vmatpush3.bf16.msra.mxu1 %v2182_v50 }
  0x26   :  { %2051 = vmatprep.mubr.msk.f32.mxu1 %vm2451_vm0, %v2452_v56  ;;  %2184 = vmatprep.subr.bf16.mxu1 %v2450_v42 }
  0x27   :  { %562 = vmatprep.mubr.bf16.mxu0 %v155_v11 }
  0x28   :  { %1929 = vmatpush3.bf16.msra.mxu0 %v2360_v53 }
  0x29   :  { %1930 = vmatprep.subr.bf16.mxu0 %v2361_v54  ;;  %2186 = vmatpush3.bf16.msra.mxu1 %v2185_v55 }
  0x2a   :  { %2187 = vmatprep.subr.bf16.mxu1 %v2450_v42 }
  0x2c   :  { %1931 = vmatpush3.bf16.msra.mxu0 %v2362_v59 }
  0x2d   :  { %1932 = vmatprep.subr.bf16.mxu0 %v2363_v60  ;;  %2189 = vmatpush3.bf16.msra.mxu1 %v2188_v61 }
  0x2e   :  { %2190 = vmatprep.subr.bf16.mxu1 %v2450_v42 }
  0x30   :  { %1933 = vmatpush3.bf16.msra.mxu0 %v2364_v0 }
  0x31   :  { %1934 = vmatprep.subr.bf16.mxu0 %v2365_v1  ;;  %2192 = vmatpush3.bf16.msra.mxu1 %v2191_v2 }
  0x32   :  { %2193 = vmatprep.subr.bf16.mxu1 %v2450_v42 }
  0x34   :  { %1935 = vmatpush3.bf16.msra.mxu0 %v2366_v5  ;;  %v735_v5 = vld [vmem:[%s3228_s4 + $0x18] sm:$0xff] }
  0x35   :  { %1936 = vmatprep.subr.bf16.mxu0 %v2367_v6  ;;  %2195 = vmatpush3.bf16.msra.mxu1 %v2194_v7  ;;  %v732_v6 = vld [vmem:[%s3228_s4] sm:$0xff]  ;;  %v2199_v7 = vpack.c.bf16 %v735_v5, %v733_v4 }
  0x36   :  { %2196 = vmatprep.subr.bf16.mxu1 %v2450_v42 }
  0x38   :  { %1937 = vmatpush3.bf16.msra.mxu0 %v2368_v12  ;;  %v2203_v12 = vpack.c.bf16 %v739_v10, %v737_v9 }
  0x39   :  { %1938 = vmatprep.subr.bf16.mxu0 %v2369_v13  ;;  %2198 = vmatpush3.bf16.msra.mxu1 %v2197_v14  ;;  %v736_v13 = vld [vmem:[%s3228_s4 + $0x20] sm:$0xff]  ;;  %v738_v14 = vld [vmem:[%s3228_s4 + $0x30] sm:$0xff] }
  0x3a   :  { %2049 = vmatprep.subr.mxu1 %v2452_v56 }
  0x3c   :  { %1939 = vmatpush3.bf16.msra.mxu0 %v2370_v15  ;;  %v741_v15 = vld [vmem:[%s3228_s4 + $0x48] sm:$0xff] }
  0x3d   :  { %1940 = vmatprep.subr.bf16.mxu0 %v2371_v16  ;;  %2050 = vmatpush3.msk.msra.mxu1 %vm609_vm1, %v603_v17  ;;  %v743_v16 = vld [vmem:[%s3228_s4 + $0x58] sm:$0xff]  ;;  %v2205_v17 = vpack.c.bf16 %v738_v14, %v736_v13 }
  0x3e   :  { %2052 = vmatmul.mubr.msk.f32.vlgmr.msra.gmra.mrb[4].mxu1 %vm605_vm2, %v590_v18  ;;  %2200 = vmatprep.subr.bf16.mxu1 %v2199_v7  ;;  %v2207_v18 = vpack.c.bf16 %v743_v16, %v741_v15  ;;  %v765_v7 = vsub.s32 1, %v2579_v30 }
  0x3f   :  { %837 = vmatprep.mubr.f32.mxu1 %v2452_v56 }
  0x40   :  { %1941 = vmatpush3.bf16.msra.mxu0 %v2372_v19  ;;  %v740_v19 = vld [vmem:[%s3228_s4 + $0x40] sm:$0xff] }
  0x41   :  { %2223 = vmatprep.subr.bf16.mxu0 %v2450_v42 }
  0x43   :  { %563 = vmatmul.mubr.bf16.vlgmr.msra.gmra.mrb[4].mxu0 %v1798_v8  ;;  %v734_v8 = vld [vmem:[%s3228_s4 + $0x10] sm:$0xff] }
  0x44   :  { %2078 = vmatprep.mubr.msk.f32.mxu0 %vm2451_vm0, %v2452_v56  ;;  %v2201_v11 = vpack.c.bf16 %v734_v8, %v732_v6  ;;  %v1849_v8 = vld [vmem:[%s3227_s7 + $0x6] ss:$8 sm:$0x3] }
  0x45   :  { %v766_v9 = vrot.slane %v1849_v8, %v765_v7 }
  0x46   :  { %2202 = vmatpush1.bf16.msra.mxu1 %v2201_v11 }
  0x47   :  { %2204 = vmatprep.subr.bf16.mxu1 %v2203_v12 }
  0x4a   :  { %2206 = vmatpush1.bf16.msra.mxu1 %v2205_v17 }
  0x4b   :  { %2208 = vmatprep.subr.bf16.mxu1 %v2207_v18 }
  0xf6   :  { %v1898_v20 = vpop.f32.mrb[0].mxu0 }
  0xf7   :  { %v1899_v22 = vpop.f32.mrb[1].mxu0  ;;  %v1920_v23 = vpop.f32.mrb[0].mxu1 }
  0xf8   :  { %v1900_v24 = vadd.f32 %v1899_v22, %v1898_v20  ;;  %v1901_v25 = vpop.f32.mrb[2].mxu0  ;;  %v1921_v26 = vpop.f32.mrb[1].mxu1  ;;  %v742_v20 = vld [vmem:[%s3228_s4 + $0x50] sm:$0xff]  ;;  %v747_v22 = vld [vmem:[%s3228_s4 + $0x78] sm:$0xff] }
  0xf9   :  { %v1902_v27 = vpop.f32.mrb[3].mxu0  ;;  %v1922_v29 = vadd.f32 %v1921_v26, %v1920_v23  ;;  %v1923_v31 = vpop.f32.mrb[2].mxu1  ;;  %v2209_v23 = vpack.c.bf16 %v742_v20, %v740_v19  ;;  %v744_v25 = vld [vmem:[%s3228_s4 + $0x60] sm:$0xff]  ;;  %v746_v26 = vld [vmem:[%s3228_s4 + $0x70] sm:$0xff] }
  0xfa   :  { %v485_v28 = vadd.f32 %v1900_v24, %v128_v21  ;;  %v1924_v32 = vpop.f32.mrb[3].mxu1  ;;  %v745_v21 = vld [vmem:[%s3228_s4 + $0x68] sm:$0xff] }
  0xfb   :  { %v2211_v24 = vpack.c.bf16 %v747_v22, %v745_v21  ;;  %v749_v27 = vld [vmem:[%s3228_s4 + $0x88] sm:$0xff]  ;;  %2210 = vmatpush1.bf16.msra.mxu1 %v2209_v23  ;;  %v748_v32 = vld [vmem:[%s3228_s4 + $0x80] sm:$0xff] }
  0xfc   :  { %v525_v33 = vadd.f32 %v1922_v29, %v485_v28  ;;  %v751_v28 = vld [vmem:[%s3228_s4 + $0x98] sm:$0xff]  ;;  %v2213_v29 = vpack.c.bf16 %v746_v26, %v744_v25  ;;  %v761_v26 = vsub.s32 0, %v2579_v30 }
  0xfd   :  { %2212 = vmatprep.subr.bf16.mxu1 %v2211_v24  ;;  %v2215_v31 = vpack.c.bf16 %v751_v28, %v749_v27 }
  0xfe   :  { %v762_v27 = vrot.slane %v1849_v8, %v761_v26 }
  0xff   :  { %2214 = vmatpush1.bf16.msra.mxu1 %v2213_v29 }
 0x100   :  { %2216 = vmatprep.subr.bf16.mxu1 %v2215_v31 }
 0x111   :  { %v679_v35 = vpop.f32.mrb[4].mxu1 }
 0x112   :  { %v680_v36 = vadd.f32 %v679_v35, %v604_v34  ;;  %v2053_v37 = vpop.f32.mrb[5].mxu1  ;;  %v753_v34 = vld [vmem:[%s3228_s4 + $0xa8] sm:$0xff]  ;;  %v755_v35 = vld [vmem:[%s3228_s4 + $0xb8] sm:$0xff] }
 0x113   :  { %v2219_v37 = vpack.c.bf16 %v755_v35, %v753_v34 }
 0x114   :  { %v683_v38 = vmax.f32 %v680_v36, 0.0 }
 0x116   :  { %v1942_v39 = vpop.f32.mrb[4].mxu0  ;;  %702 = vrot.lane.b32.xlu0 %v683_v38, %s2453_s23  ;;  %v686_v48 = vsel %vm573_vm3, %v683_v38, 0.0 }
 0x117   :  { %v1943_v40 = vpop.f32.mrb[5].mxu0 }
 0x118   :  { %v1944_v41 = vadd.f32 %v1943_v40, %v1942_v39  ;;  %v1945_v43 = vpop.f32.mrb[6].mxu0  ;;  %v754_v39 = vld [vmem:[%s3228_s4 + $0xb0] sm:$0xff] }
 0x119   :  { %v1946_v44 = vpop.f32.mrb[7].mxu0 }
 0x11a   :  { %v565_v45 = vadd.f32 %v1944_v41, %v525_v33  ;;  %v750_v33 = vld [vmem:[%s3228_s4 + $0x90] sm:$0xff] }
 0x11b   :  { %v2217_v36 = vpack.c.bf16 %v750_v33, %v748_v32 }
 0x11c   :  { %v570_v46 = vmax.f32 %v565_v45, 0.0 }
 0x11d   :  { %2218 = vmatpush1.bf16.msra.mxu1 %v2217_v36 }
 0x11e   :  { %v574_v47 = vsel %vm573_vm3, %v570_v46, 0.0  ;;  %2220 = vmatprep.subr.bf16.mxu1 %v2219_v37 }
 0x11f   :  { %575 = vadd.xlane.f32.xlu1 %v574_v47 }
 0x123   :  { %687 = vadd.xlane.f32.xlu1 %v686_v48  ;;  %v572_v48 = vld [vmem:[%s3227_s7 + $0x2] ss:$0 sm:$0xff] }
 0x188   :  { %v703_v49 = vpop.permute.xlu0 %702 }
 0x189   :  { %v705_v50 = vsel %vm573_vm3, %v703_v49, 0.0 }
 0x18a   :  { %706 = vadd.xlane.f32.xlu0 %v705_v50 }
 0x1ac   :  { %v576_v51 = vpop.xlane.xlu1 %575 }
 0x1ad   :  { %v578_v62 = vmul.f32 0.03125, %v576_v51 }
 0x1af   :  { %v2730_v63 = vsub.f32 %v570_v46, %v578_v62  ;;  %v571_v46 = vld [vmem:[%s3227_s7 + $0x1] ss:$0 sm:$0xff] }
 0x1b0   :  { %v688_v52 = vpop.xlane.xlu1 %687 }
 0x1b1   :  { %v689_v53 = vmul.f32 0.03125, %v688_v52  ;;  %v580_v0 = vmul.f32 %v2730_v63, %v2730_v63 }
 0x1b3   :  { %v2720_v54 = vsub.f32 %v683_v38, %v689_v53  ;;  %v581_v1 = vsel %vm573_vm3, %v580_v0, 0.0  ;;  %v684_v0 = vld [vmem:[%s3227_s7 + $0x4] ss:$0 sm:$0xff] }
 0x1b5   :  { %v691_v55 = vmul.f32 %v2720_v54, %v2720_v54 }
 0x1b7   :  { %v692_v57 = vsel %vm573_vm3, %v691_v55, 0.0 }
 0x1b8   :  { %693 = vadd.xlane.f32.xlu0 %v692_v57 }
 0x217   :  { %v707_v58 = vpop.xlane.xlu0 %706 }
 0x218   :  { %v708_v59 = vmul.f32 0.03125, %v707_v58 }
 0x21a   :  { %v2725_v60 = vsub.f32 %v683_v38, %v708_v59  ;;  %v752_v38 = vld [vmem:[%s3228_s4 + $0xa0] sm:$0xff]  ;;  %s2454_s4 = smov 64  }
 0x21b   :  { %v2221_v40 = vpack.c.bf16 %v754_v39, %v752_v38 }
 0x21c   :  { %v710_v61 = vmul.f32 %v2725_v60, %v2725_v60 }
 0x21d   :  { %2222 = vmatpush1.bf16.msra.mxu1 %v2221_v40 }
 0x21e   :  { %712 = vrot.lane.b32.xlu1 %v710_v61, %s2453_s23  ;;  %2241 = vmatprep.subr.bf16.mxu1 %v2450_v42 }
 0x242   :  { %582 = vadd.xlane.f32.xlu1 %v581_v1 }
 0x245   :  { %v694_v51 = vpop.xlane.xlu0 %693 }
 0x246   :  { %v695_v55 = vmul.f32 0.03125, %v694_v51 }
 0x248   :  { %v696_v58 = vadd.f32 1e-05, %v695_v55 }
 0x290   :  { %v713_v2 = vpop.permute.xlu1 %712 }
 0x291   :  { %v715_v3 = vsel %vm573_vm3, %v713_v2, 0.0 }
 0x292   :  { %716 = vadd.xlane.f32.xlu0 %v715_v3  ;;  %v685_v3 = vld [vmem:[%s3227_s7 + $0x5] ss:$0 sm:$0xff] }
 0x2cf   :  { %v583_v41 = vpop.xlane.xlu1 %582 }
 0x2d0   :  { %v584_v43 = vmul.f32 0.03125, %v583_v41 }
 0x2d2   :  { %v585_v44 = vadd.f32 1e-05, %v584_v43 }
 0x2d4   :  { %2373 = vrsqrt.f32 %v585_v44 }
 0x2de   :  { %v2374_v45 = vpop.eup %2373 }
 0x2df   :  { %v587_v47 = vmul.f32 %v2374_v45, %v2730_v63 }
 0x2e1   :  { %v588_v49 = vmul.f32 %v587_v47, %v571_v46 }
 0x2e3   :  { %v589_v50 = vadd.f32 %v588_v49, %v572_v48 }
 0x2e5   :  { %725 = vrot.lane.b32.xlu0 %v589_v50, %s2454_s4 }
 0x31f   :  { %v717_v52 = vpop.xlane.xlu0 %716 }
 0x320   :  { %v718_v53 = vmul.f32 0.03125, %v717_v52 }
 0x322   :  { %v719_v57 = vadd.f32 1e-05, %v718_v53 }
 0x324   :  { %2375 = vrsqrt.f32 %v719_v57 }
 0x325   :  { %2377 = vrsqrt.f32 %v696_v58 }
 0x32e   :  { %v2376_v59 = vpop.eup %2375 }
 0x32f   :  { %v2378_v61 = vpop.eup %2377  ;;  %v721_v62 = vmul.f32 %v2376_v59, %v2725_v60 }
 0x330   :  { %v698_v63 = vmul.f32 %v2378_v61, %v2720_v54 }
 0x331   :  { %v722_v1 = vmul.f32 %v721_v62, %v684_v0 }
 0x332   :  { %v699_v2 = vmul.f32 %v698_v63, %v684_v0 }
 0x333   :  { %v723_v4 = vadd.f32 %v722_v1, %v685_v3 }
 0x334   :  { %v700_v5 = vadd.f32 %v699_v2, %v685_v3 }
 0x336   :  { %v729_v6 = vsel %vm728_vm4, %v700_v5, %v723_v4 }
 0x357   :  { %v726_v60 = vpop.permute.xlu0 %725 }
 0x358   :  { %v731_v54 = vsel %vm730_vm5, %v729_v6, %v726_v60 }
 0x359   :  { %1850 = vmatmul.mubr.msk.f32.vlgmr.msra.gmra.mrb[6].mxu1 %vm769_vm6, %v731_v54 }
 0x35a   :  { %2105 = vmatprep.mubr.msk.f32.mxu1 %vm2451_vm0, %v2452_v56 }
 0x42c   :  { %v839_v10 = vpop.f32.mrb[6].mxu1 }
 0x42d   :  { %v841_v11 = vpop.f32.mrb[7].mxu1  ;;  %v840_v28 = vadd.f32 %v839_v10, %v762_v27 }
 0x42e   :  { %v842_v12 = vadd.f32 %v841_v11, %v766_v9 }
 0x42f   :  { %v1851_v29 = vmul.f32 -1.442695, %v840_v28 }
 0x430   :  { %v1852_v13 = vmul.f32 -1.442695, %v842_v12 }
 0x432   :  { %2379 = vpow2.f32 %v1852_v13 }
 0x43c   :  { %v2380_v14 = vpop.eup %2379 }
 0x43d   :  { %v851_v15 = vadd.f32 1.0, %v2380_v14 }
 0x43f   :  { %2381 = vrcp.f32 %v851_v15 }
 0x440   :  { %2383 = vpow2.f32 %v1851_v29 }
 0x449   :  { %v2836_v16 = vpop.eup %2381 }
 0x44a   :  { %870 = vrot.lane.b32.xlu0 %v2836_v16, %s2454_s4  ;;  %862 = vrot.lane.b32.xlu1 %v2836_v16, %s2453_s23  ;;  %v856_v17 = vmul.f32 %v2836_v16, %v2836_v16  ;;  %v2384_v34 = vpop.eup %2383 }
 0x44b   :  { %v850_v37 = vadd.f32 1.0, %v2384_v34 }
 0x44c   :  { %v857_v36 = vsel %vm573_vm3, %v856_v17, 0.0 }
 0x44d   :  { %2385 = vrcp.f32 %v850_v37 }
 0x44e   :  { %907 = vrot.lane.b32.xlu0 %v856_v17, %s2453_s23 }
 0x457   :  { %v2858_v38 = vpop.eup %2385 }
 0x4bc   :  { %v863_v18 = vpop.permute.xlu1 %862  ;;  %v871_v21 = vpop.permute.xlu0 %870 }
 0x4bd   :  { %v865_v19 = vmul.f32 %v2836_v16, %v863_v18  ;;  %v873_v23 = vmul.f32 %v2836_v16, %v871_v21 }
 0x4bf   :  { %915 = vrot.lane.b32.xlu0 %v865_v19, %s2453_s23  ;;  %v866_v20 = vsel %vm573_vm3, %v865_v19, 0.0  ;;  %v874_v25 = vsel %vm573_vm3, %v873_v23, 0.0 }
 0x4c0   :  { %867 = vadd.xlane.f32.xlu1 %v866_v20  ;;  %v908_v22 = vpop.permute.xlu0 %907 }
 0x4c1   :  { %v910_v24 = vsel %vm573_vm3, %v908_v22, 0.0 }
 0x4c3   :  { %950 = vrot.lane.b32.xlu0 %v856_v17, %s2454_s4 }
 0x4e2   :  { %911 = vadd.xlane.f32.xlu0 %v910_v24 }
 0x4e6   :  { %875 = vadd.xlane.f32.xlu0 %v874_v25 }
 0x531   :  { %v916_v31 = vpop.permute.xlu0 %915 }
 0x532   :  { %v918_v32 = vsel %vm573_vm3, %v916_v31, 0.0 }
 0x533   :  { %919 = vadd.xlane.f32.xlu1 %v918_v32 }
 0x535   :  { %v951_v33 = vpop.permute.xlu0 %950 }
 0x536   :  { %v953_v35 = vsel %vm573_vm3, %v951_v33, 0.0 }
 0x537   :  { %954 = vadd.xlane.f32.xlu0 %v953_v35  ;;  %858 = vadd.xlane.f32.xlu1 %v857_v36 }
 0x548   :  { %1144 = vrot.lane.b32.xlu1 %v2858_v38, %s2454_s4 }
 0x54d   :  { %1114 = vrot.lane.b32.xlu0 %v2858_v38, %s2453_s23  ;;  %v868_v40 = vpop.xlane.xlu1 %867 }
 0x54e   :  { %v869_v43 = vmul.f32 0.25, %v868_v40 }
 0x56f   :  { %v912_v39 = vpop.xlane.xlu0 %911 }
 0x570   :  { %v913_v41 = vmul.f32 0.25, %v912_v39 }
 0x572   :  { %v922_v46 = vmax.f32 %v869_v43, %v913_v41 }
 0x573   :  { %v876_v44 = vpop.xlane.xlu0 %875 }
 0x574   :  { %v877_v48 = vmul.f32 0.25, %v876_v44  ;;  %v995_v44 = vld [vmem:[%s3229_s5] sm:$0xff] }
 0x5c0   :  { %v920_v45 = vpop.xlane.xlu1 %919 }
 0x5c1   :  { %v921_v47 = vmul.f32 0.25, %v920_v45  ;;  %v996_v45 = vld [vmem:[%s3229_s5 + $0x8] sm:$0xff] }
 0x5c3   :  { %v923_v49 = vmax.f32 %v922_v46, %v921_v47  ;;  %v957_v50 = vmax.f32 %v877_v48, %v921_v47  ;;  %v997_v46 = vld [vmem:[%s3229_s5 + $0x10] sm:$0xff] }
 0x5c4   :  { %v955_v51 = vpop.xlane.xlu0 %954  ;;  %v859_v52 = vpop.xlane.xlu1 %858 }
 0x5c5   :  { %v924_v53 = vsub.f32 %v869_v43, %v923_v49  ;;  %v927_v55 = vsub.f32 %v913_v41, %v923_v49  ;;  %v930_v57 = vsub.f32 %v921_v47, %v923_v49  ;;  %v956_v58 = vmul.f32 0.25, %v955_v51  ;;  %v1000_v51 = vld [vmem:[%s3229_s5 + $0x28] sm:$0xff] }
 0x5c6   :  { %v860_v59 = vmul.f32 0.25, %v859_v52 }
 0x5c7   :  { %v925_v61 = vmul.f32 1.442695, %v924_v53  ;;  %v928_v62 = vmul.f32 1.442695, %v927_v55  ;;  %v931_v63 = vmul.f32 1.442695, %v930_v57  ;;  %v958_v0 = vmax.f32 %v957_v50, %v956_v58 }
 0x5c8   :  { %v878_v1 = vmax.f32 %v860_v59, %v869_v43  ;;  %v1145_v36 = vpop.permute.xlu1 %1144  ;;  %v1115_v37 = vpop.permute.xlu0 %1114  ;;  %v999_v50 = vld [vmem:[%s3229_s5 + $0x20] sm:$0xff]  ;;  %v1001_v53 = vld [vmem:[%s3229_s5 + $0x30] sm:$0xff]  ;;  %v1002_v55 = vld [vmem:[%s3229_s5 + $0x38] sm:$0xff] }
 0x5c9   :  { %2387 = vpow2.f32 %v928_v62  ;;  %v959_v2 = vsub.f32 %v877_v48, %v958_v0  ;;  %v962_v3 = vsub.f32 %v921_v47, %v958_v0  ;;  %v965_v4 = vsub.f32 %v956_v58, %v958_v0  ;;  %v1003_v58 = vld [vmem:[%s3229_s5 + $0x40] sm:$0xff]  ;;  %v1005_v62 = vld [vmem:[%s3229_s5 + $0x50] sm:$0xff] }
 0x5ca   :  { %2389 = vpow2.f32 %v931_v63  ;;  %v879_v5 = vmax.f32 %v878_v1, %v877_v48  ;;  %v1147_v39 = vsel %vm573_vm3, %v1145_v36, 0.0  ;;  %v1117_v40 = vsel %vm573_vm3, %v1115_v37, 0.0  ;;  %v1006_v63 = vld [vmem:[%s3229_s5 + $0x58] sm:$0xff] }
 0x5cb   :  { %v960_v6 = vmul.f32 1.442695, %v959_v2  ;;  %v963_v60 = vmul.f32 1.442695, %v962_v3  ;;  %v966_v54 = vmul.f32 1.442695, %v965_v4  ;;  %2391 = vpow2.f32 %v925_v61 }
 0x5cc   :  { %v880_v8 = vsub.f32 %v860_v59, %v879_v5  ;;  %v883_v9 = vsub.f32 %v869_v43, %v879_v5  ;;  %v886_v10 = vsub.f32 %v877_v48, %v879_v5  ;;  %v2224_v47 = vpack.c.bf16 %v996_v45, %v995_v44  ;;  %v998_v48 = vld [vmem:[%s3229_s5 + $0x18] sm:$0xff]  ;;  %v1004_v59 = vld [vmem:[%s3229_s5 + $0x48] sm:$0xff] }
 0x5cd   :  { %2393 = vpow2.f32 %v960_v6  ;;  %v2227_v49 = vpack.c.bf16 %v998_v48, %v997_v46  ;;  %v2230_v52 = vpack.c.bf16 %v1000_v51, %v999_v50  ;;  %v2233_v57 = vpack.c.bf16 %v1002_v55, %v1001_v53  ;;  %v1096_v48 = vld [vmem:[%s3227_s7 + $0x10] ss:$0 sm:$0xff] }
 0x5ce   :  { %2395 = vpow2.f32 %v963_v60  ;;  %v881_v11 = vmul.f32 1.442695, %v880_v8  ;;  %v884_v12 = vmul.f32 1.442695, %v883_v9  ;;  %v887_v13 = vmul.f32 1.442695, %v886_v10  ;;  %2225 = vmatpush3.bf16.msra.mxu0 %v2224_v47 }
 0x5cf   :  { %2397 = vpow2.f32 %v966_v54  ;;  %2226 = vmatprep.subr.bf16.mxu0 %v2450_v42  ;;  %v2236_v61 = vpack.c.bf16 %v1004_v59, %v1003_v58  ;;  %v2239_v0 = vpack.c.bf16 %v1006_v63, %v1005_v62 }
 0x5d0   :  { %2399 = vpow2.f32 %v881_v11 }
 0x5d1   :  { %2401 = vpow2.f32 %v884_v12 }
 0x5d2   :  { %2403 = vpow2.f32 %v887_v13  ;;  %2228 = vmatpush3.bf16.msra.mxu0 %v2227_v49  ;;  %v1097_v49 = vld [vmem:[%s3227_s7 + $0x11] ss:$0 sm:$0xff] }
 0x5d3   :  { %v2388_v14 = vpop.eup %2387  ;;  %2229 = vmatprep.subr.bf16.mxu0 %v2450_v42 }
 0x5d4   :  { %v2390_v15 = vpop.eup %2389  ;;  %v936_v17 = vmul.f32 %v2388_v14, %v2836_v16 }
 0x5d5   :  { %v2392_v18 = vpop.eup %2391  ;;  %v942_v22 = vmul.f32 %v2390_v15, %v2836_v16 }
 0x5d6   :  { %938 = vrot.lane.b32.xlu1 %v936_v17, %s2453_s23  ;;  %v933_v19 = vadd.f32 %v2392_v18, %v2388_v14  ;;  %2231 = vmatpush3.bf16.msra.mxu0 %v2230_v52  ;;  %v935_v2 = vmul.f32 %v2392_v18, %v2836_v16  ;;  %v1098_v14 = vsel %vm573_vm3, %v2858_v38, 0.0 }
 0x5d7   :  { %v2866_v20 = vpop.eup %2393  ;;  %2232 = vmatprep.subr.bf16.mxu0 %v2450_v42 }
 0x5d8   :  { %v2396_v21 = vpop.eup %2395  ;;  %v934_v23 = vadd.f32 %v2390_v15, %v933_v19  ;;  %v970_v54 = vmul.f32 %v2866_v20, %v2836_v16 }
 0x5d9   :  { %v2398_v24 = vpop.eup %2397  ;;  %v971_v25 = vmul.f32 %v2396_v21, %v2836_v16  ;;  %v968_v27 = vadd.f32 %v2396_v21, %v2866_v20 }
 0x5da   :  { %v2871_v28 = vpop.eup %2399  ;;  %944 = vrot.lane.b32.xlu1 %v942_v22, %s2454_s4  ;;  %v977_v34 = vmul.f32 %v2398_v24, %v2836_v16  ;;  %2234 = vmatpush3.bf16.msra.mxu0 %v2233_v57  ;;  %2405 = vrcp.f32 %v934_v23 }
 0x5db   :  { %v2402_v29 = vpop.eup %2401  ;;  %973 = vrot.lane.b32.xlu0 %v971_v25, %s2453_s23  ;;  %v969_v31 = vadd.f32 %v2398_v24, %v968_v27  ;;  %2235 = vmatprep.subr.bf16.mxu0 %v2450_v42  ;;  %v891_v21 = vmul.f32 %v2871_v28, %v2836_v16 }
 0x5dc   :  { %v889_v32 = vadd.f32 %v2402_v29, %v2871_v28  ;;  %v2404_v33 = vpop.eup %2403  ;;  %v892_v43 = vmul.f32 %v2402_v29, %v2836_v16 }
 0x5dd   :  { %v898_v41 = vmul.f32 %v2404_v33, %v2836_v16  ;;  %2407 = vrcp.f32 %v969_v31 }
 0x5de   :  { %v890_v35 = vadd.f32 %v2404_v33, %v889_v32  ;;  %2237 = vmatpush3.bf16.msra.mxu0 %v2236_v61 }
 0x5df   :  { %979 = vrot.lane.b32.xlu0 %v977_v34, %s2454_s4  ;;  %2238 = vmatprep.subr.bf16.mxu0 %v2450_v42 }
 0x5e0   :  { %2409 = vrcp.f32 %v890_v35 }
 0x5e2   :  { %2240 = vmatpush3.bf16.msra.mxu0 %v2239_v0 }
 0x5e4   :  { %v2406_v60 = vpop.eup %2405 }
 0x5e7   :  { %v2408_v12 = vpop.eup %2407 }
 0x5ea   :  { %v2410_v31 = vpop.eup %2409 }
 0x5fe   :  { %1148 = vadd.xlane.f32.xlu0 %v1147_v39  ;;  %1118 = vadd.xlane.f32.xlu1 %v1117_v40 }
 0x60f   :  { %900 = vrot.lane.b32.xlu1 %v898_v41, %s2454_s4 }
 0x614   :  { %894 = vrot.lane.b32.xlu0 %v892_v43, %s2453_s23 }
 0x648   :  { %v939_v1 = vpop.permute.xlu1 %938 }
 0x649   :  { %v941_v3 = vadd.f32 %v939_v1, %v935_v2 }
 0x64c   :  { %v945_v4 = vpop.permute.xlu1 %944 }
 0x64d   :  { %v947_v5 = vadd.f32 %v945_v4, %v941_v3  ;;  %v974_v6 = vpop.permute.xlu0 %973 }
 0x64e   :  { %v976_v9 = vadd.f32 %v974_v6, %v970_v54 }
 0x64f   :  { %v949_v8 = vmul.f32 %v2406_v60, %v947_v5 }
 0x651   :  { %v980_v10 = vpop.permute.xlu0 %979  ;;  %986 = vrot.lane.b32.xlu1 %v949_v8, %s2455_s9  ;;  %v1007_v8 = vld [vmem:[%s3227_s7 + $0x7] ss:$0 sm:$0xff] }
 0x652   :  { %v982_v11 = vadd.f32 %v980_v10, %v976_v9 }
 0x654   :  { %v984_v13 = vmul.f32 %v2408_v12, %v982_v11 }
 0x656   :  { %990 = vrot.lane.b32.xlu0 %v984_v13, %s2454_s4 }
 0x675   :  { %1099 = vadd.xlane.f32.xlu1 %v1098_v14 }
 0x68b   :  { %v1149_v15 = vpop.xlane.xlu0 %1148  ;;  %v1119_v17 = vpop.xlane.xlu1 %1118 }
 0x68c   :  { %v1150_v18 = vmul.f32 0.03125, %v1149_v15  ;;  %v1120_v19 = vmul.f32 0.03125, %v1119_v17  ;;  %v1089_v15 = vrot.slane %v2836_v16, %v765_v7 }
 0x68e   :  { %v1121_v20 = vsub.f32 %v2858_v38, %v1120_v19  ;;  %v1151_v24 = vsub.f32 %v2858_v38, %v1150_v18 }
 0x68f   :  { %v895_v22 = vpop.permute.xlu0 %894  ;;  %v901_v23 = vpop.permute.xlu1 %900 }
 0x690   :  { %v897_v25 = vadd.f32 %v895_v22, %v891_v21  ;;  %v1122_v27 = vmul.f32 %v1121_v20, %v1121_v20  ;;  %v1152_v33 = vmul.f32 %v1151_v24, %v1151_v24  ;;  %v1093_v21 = vsub.s32 2, %v2579_v30 }
 0x692   :  { %v903_v29 = vadd.f32 %v901_v23, %v897_v25  ;;  %1124 = vrot.lane.b32.xlu0 %v1122_v27, %s2453_s23  ;;  %v1094_v7 = vrot.slane %v2836_v16, %v1093_v21 }
 0x694   :  { %v905_v32 = vmul.f32 %v2410_v31, %v903_v29 }
 0x696   :  { %1154 = vrot.lane.b32.xlu0 %v1152_v33, %s2454_s4 }
 0x6c3   :  { %v987_v34 = vpop.permute.xlu1 %986 }
 0x6c4   :  { %v993_v35 = vsel %vm728_vm4, %v905_v32, %v987_v34 }
 0x6c8   :  { %v991_v36 = vpop.permute.xlu0 %990 }
 0x6c9   :  { %v994_v28 = vsel %vm730_vm5, %v993_v35, %v991_v36 }
 0x6ca   :  { %2079 = vmatmul.mubr.msk.f32.vlgmr.msra.gmra.mrb[8].mxu0 %vm769_vm6, %v994_v28 }
 0x702   :  { %v1100_v37 = vpop.xlane.xlu1 %1099 }
 0x703   :  { %v1101_v39 = vmul.f32 0.03125, %v1100_v37 }
 0x704   :  { %v1125_v40 = vpop.permute.xlu0 %1124 }
 0x705   :  { %v1102_v41 = vsub.f32 %v2858_v38, %v1101_v39  ;;  %v1127_v43 = vsel %vm573_vm3, %v1125_v40, 0.0 }
 0x706   :  { %1128 = vadd.xlane.f32.xlu1 %v1127_v43 }
 0x707   :  { %v1103_v44 = vmul.f32 %v1102_v41, %v1102_v41 }
 0x708   :  { %v1155_v45 = vpop.permute.xlu0 %1154 }
 0x709   :  { %v1157_v46 = vsel %vm573_vm3, %v1155_v45, 0.0  ;;  %v1104_v47 = vsel %vm573_vm3, %v1103_v44, 0.0  ;;  %v1084_v44 = vrot.slane %v2836_v16, %v761_v26 }
 0x70a   :  { %1158 = vadd.xlane.f32.xlu1 %v1157_v46  ;;  %1105 = vadd.xlane.f32.xlu0 %v1104_v47 }
 0x71b   :  { %1164 = vrot.lane.b32.xlu1 %v1096_v48, %s2454_s4 }
 0x71f   :  { %1140 = vrot.lane.b32.xlu1 %v1097_v49, %s2455_s9 }
 0x720   :  { %1135 = vrot.lane.b32.xlu0 %v1096_v48, %s2455_s9 }
 0x724   :  { %1168 = vrot.lane.b32.xlu0 %v1097_v49, %s2454_s4 }
 0x793   :  { %v1129_v50 = vpop.xlane.xlu1 %1128 }
 0x794   :  { %v1130_v51 = vmul.f32 0.03125, %v1129_v50 }
 0x796   :  { %v1131_v52 = vadd.f32 1e-05, %v1130_v51 }
 0x797   :  { %v1106_v53 = vpop.xlane.xlu0 %1105  ;;  %v1159_v55 = vpop.xlane.xlu1 %1158 }
 0x798   :  { %v1107_v57 = vmul.f32 0.03125, %v1106_v53  ;;  %v1160_v58 = vmul.f32 0.03125, %v1159_v55  ;;  %2411 = vrsqrt.f32 %v1131_v52 }
 0x79a   :  { %v1108_v59 = vadd.f32 1e-05, %v1107_v57  ;;  %v1161_v61 = vadd.f32 1e-05, %v1160_v58 }
 0x79b   :  { %v1165_v2 = vpop.permute.xlu1 %1164  ;;  %v1136_v60 = vpop.permute.xlu0 %1135 }
 0x79c   :  { %2413 = vrsqrt.f32 %v1108_v59 }
 0x79d   :  { %2415 = vrsqrt.f32 %v1161_v61  ;;  %v1077_v62 = vpop.f32.mrb[8].mxu0 }
 0x79e   :  { %v2080_v63 = vpop.f32.mrb[9].mxu0  ;;  %v1078_v14 = vadd.f32 %v1077_v62, %v1007_v8 }
 0x79f   :  { %v1141_v12 = vpop.permute.xlu1 %1140  ;;  %v1169_v13 = vpop.permute.xlu0 %1168 }
 0x7a0   :  { %v1090_v19 = vadd.f32 %v1089_v15, %v1078_v14  ;;  %v1095_v25 = vadd.f32 %v1094_v7, %v1078_v14  ;;  %v1085_v45 = vadd.f32 %v1084_v44, %v1078_v14 }
 0x7a2   :  { %v2412_v0 = vpop.eup %2411 }
 0x7a3   :  { %v1133_v5 = vmul.f32 %v2412_v0, %v1121_v20 }
 0x7a5   :  { %v1138_v11 = vmul.f32 %v1136_v60, %v1133_v5 }
 0x7a6   :  { %v2414_v1 = vpop.eup %2413 }
 0x7a7   :  { %v2416_v3 = vpop.eup %2415  ;;  %v1110_v4 = vmul.f32 %v2414_v1, %v1102_v41  ;;  %v2967_v17 = vadd.f32 %v1141_v12, %v1138_v11 }
 0x7a8   :  { %v1163_v6 = vmul.f32 %v2416_v3, %v1151_v24 }
 0x7a9   :  { %v1111_v54 = vmul.f32 %v1110_v4, %v1096_v48  ;;  %v1236_v20 = vmul.f32 %v2967_v17, %v1090_v19 }
 0x7aa   :  { %v1167_v10 = vmul.f32 %v1165_v2, %v1163_v6 }
 0x7ab   :  { %v2958_v9 = vadd.f32 %v1111_v54, %v1097_v49 }
 0x7ac   :  { %v2969_v18 = vadd.f32 %v1169_v13, %v1167_v10 }
 0x7ad   :  { %1285 = vrot.lane.b32.xlu0 %v2958_v9, %s2454_s4  ;;  %1224 = vrot.lane.b32.xlu1 %v2958_v9, %s2455_s9  ;;  %v1172_v50 = vmul.f32 %v2958_v9, %v1085_v45 }
 0x7ae   :  { %v1309_v34 = vmul.f32 %v2969_v18, %v1095_v25 }
 0x7af   :  { %v1173_v30 = vsel %vm573_vm3, %v1172_v50, 0.0 }
 0x7b1   :  { %1245 = vrot.lane.b32.xlu0 %v2969_v18, %s2453_s23  ;;  %1297 = vrot.lane.b32.xlu1 %v2967_v17, %s2455_s9 }
 0x7b5   :  { %1238 = vrot.lane.b32.xlu0 %v1236_v20, %s2453_s23 }
 0x81f   :  { %v1286_v22 = vpop.permute.xlu0 %1285  ;;  %v1225_v23 = vpop.permute.xlu1 %1224 }
 0x820   :  { %v1227_v24 = vmul.f32 %v1225_v23, %v1090_v19  ;;  %v1288_v29 = vmul.f32 %v1286_v22, %v1095_v25 }
 0x822   :  { %1229 = vrot.lane.b32.xlu1 %v1227_v24, %s2453_s23 }
 0x823   :  { %v1298_v27 = vpop.permute.xlu1 %1297  ;;  %v1246_v32 = vpop.permute.xlu0 %1245 }
 0x824   :  { %v1300_v31 = vmul.f32 %v1298_v27, %v1095_v25  ;;  %v1248_v33 = vmul.f32 %v1246_v32, %v1090_v19 }
 0x826   :  { %1290 = vrot.lane.b32.xlu1 %v1288_v29, %s2454_s4  ;;  %1302 = vrot.lane.b32.xlu0 %v1300_v31, %s2454_s4 }
 0x827   :  { %v1239_v35 = vpop.permute.xlu0 %1238 }
 0x828   :  { %v1241_v36 = vsel %vm573_vm3, %v1239_v35, 0.0 }
 0x82a   :  { %1250 = vrot.lane.b32.xlu1 %v1248_v33, %s2453_s23  ;;  %1311 = vrot.lane.b32.xlu0 %v1309_v34, %s2454_s4 }
 0x82e   :  { %1178 = vrot.lane.b32.xlu1 %v2967_v17, %s2453_s23  ;;  %1187 = vrot.lane.b32.xlu0 %v2969_v18, %s2454_s4 }
 0x84d   :  { %1242 = vadd.xlane.f32.xlu0 %v1241_v36 }
 0x894   :  { %v1230_v28 = vpop.permute.xlu1 %1229 }
 0x895   :  { %v1232_v37 = vsel %vm573_vm3, %v1230_v28, 0.0 }
 0x896   :  { %1233 = vadd.xlane.f32.xlu1 %v1232_v37 }
 0x898   :  { %v1303_v39 = vpop.permute.xlu0 %1302  ;;  %v1291_v40 = vpop.permute.xlu1 %1290 }
 0x899   :  { %v1305_v41 = vsel %vm573_vm3, %v1303_v39, 0.0  ;;  %v1293_v43 = vsel %vm573_vm3, %v1291_v40, 0.0 }
 0x89a   :  { %1306 = vadd.xlane.f32.xlu1 %v1305_v41  ;;  %1294 = vadd.xlane.f32.xlu0 %v1293_v43 }
 0x89c   :  { %v1312_v46 = vpop.permute.xlu0 %1311  ;;  %v1251_v47 = vpop.permute.xlu1 %1250 }
 0x89d   :  { %v1314_v48 = vsel %vm573_vm3, %v1312_v46, 0.0  ;;  %v1253_v49 = vsel %vm573_vm3, %v1251_v47, 0.0 }
 0x89e   :  { %1315 = vadd.xlane.f32.xlu1 %v1314_v48  ;;  %1254 = vadd.xlane.f32.xlu0 %v1253_v49 }
 0x8a0   :  { %v1188_v51 = vpop.permute.xlu0 %1187  ;;  %v1179_v52 = vpop.permute.xlu1 %1178 }
 0x8a1   :  { %v1190_v53 = vmul.f32 %v1188_v51, %v1085_v45  ;;  %v1181_v55 = vmul.f32 %v1179_v52, %v1085_v45  ;;  %v1854_v52 = vld [vmem:[%s3229_s5 + $0x60] sm:$0xff] }
 0x8a2   :  { %1174 = vadd.xlane.f32.xlu0 %v1173_v30 }
 0x8a3   :  { %v1182_v16 = vsel %vm573_vm3, %v1181_v55, 0.0  ;;  %v1191_v26 = vsel %vm573_vm3, %v1190_v53, 0.0  ;;  %v1855_v53 = vld [vmem:[%s3229_s5 + $0x68] sm:$0xff]  ;;  %v1856_v55 = vld [vmem:[%s3229_s5 + $0x70] sm:$0xff] }
 0x8a4   :  { %1183 = vadd.xlane.f32.xlu1 %v1182_v16 }
 0x8a6   :  { %1192 = vadd.xlane.f32.xlu0 %v1191_v26  ;;  %v2242_v26 = vpack.c.bf16 %v1855_v53, %v1854_v52 }
 0x8a8   :  { %2243 = vmatpush3.bf16.msra.mxu1 %v2242_v26 }
 0x8a9   :  { %2244 = vmatprep.subr.bf16.mxu1 %v2450_v42 }
 0x8da   :  { %v1243_v57 = vpop.xlane.xlu0 %1242 }
 0x8db   :  { %v1244_v1 = vmul.f32 0.5, %v1243_v57  ;;  %v1857_v57 = vld [vmem:[%s3229_s5 + $0x78] sm:$0xff] }
 0x923   :  { %v1234_v58 = vpop.xlane.xlu1 %1233 }
 0x924   :  { %v1235_v62 = vmul.f32 0.5, %v1234_v58 }
 0x926   :  { %v1257_v4 = vmax.f32 %v1235_v62, %v1244_v1 }
 0x927   :  { %v1295_v59 = vpop.xlane.xlu0 %1294  ;;  %v1307_v61 = vpop.xlane.xlu1 %1306 }
 0x928   :  { %v1296_v63 = vmul.f32 0.5, %v1295_v59  ;;  %v1308_v0 = vmul.f32 0.5, %v1307_v61  ;;  %v2245_v59 = vpack.c.bf16 %v1857_v57, %v1856_v55  ;;  %v1858_v61 = vld [vmem:[%s3229_s5 + $0x80] sm:$0xff] }
 0x92a   :  { %v1318_v5 = vmax.f32 %v1296_v63, %v1308_v0  ;;  %2246 = vmatpush3.bf16.msra.mxu1 %v2245_v59 }
 0x92b   :  { %v1255_v2 = vpop.xlane.xlu0 %1254  ;;  %v1316_v3 = vpop.xlane.xlu1 %1315  ;;  %2247 = vmatprep.subr.bf16.mxu1 %v2450_v42 }
 0x92c   :  { %v1256_v6 = vmul.f32 0.5, %v1255_v2  ;;  %v1317_v60 = vmul.f32 0.5, %v1316_v3 }
 0x92e   :  { %v1258_v54 = vmax.f32 %v1257_v4, %v1256_v6  ;;  %v1319_v8 = vmax.f32 %v1318_v5, %v1317_v60 }
 0x92f   :  { %v1175_v10 = vpop.xlane.xlu0 %1174 }
 0x930   :  { %v1259_v11 = vsub.f32 %v1235_v62, %v1258_v54  ;;  %v1262_v12 = vsub.f32 %v1244_v1, %v1258_v54  ;;  %v1265_v13 = vsub.f32 %v1256_v6, %v1258_v54  ;;  %v1320_v14 = vsub.f32 %v1296_v63, %v1319_v8  ;;  %v1859_v62 = vld [vmem:[%s3229_s5 + $0x88] sm:$0xff]  ;;  %v1860_v6 = vld [vmem:[%s3229_s5 + $0x90] sm:$0xff] }
 0x931   :  { %v1323_v15 = vsub.f32 %v1308_v0, %v1319_v8  ;;  %v1184_v19 = vpop.xlane.xlu1 %1183  ;;  %v1326_v23 = vsub.f32 %v1317_v60, %v1319_v8  ;;  %v1176_v24 = vmul.f32 0.5, %v1175_v10  ;;  %v2248_v5 = vpack.c.bf16 %v1859_v62, %v1858_v61  ;;  %v1861_v60 = vld [vmem:[%s3229_s5 + $0x98] sm:$0xff]  ;;  %v1862_v10 = vld [vmem:[%s3229_s5 + $0xa0] sm:$0xff] }
 0x932   :  { %v1260_v20 = vmul.f32 1.442695, %v1259_v11  ;;  %v1263_v21 = vmul.f32 1.442695, %v1262_v12  ;;  %v1266_v22 = vmul.f32 1.442695, %v1265_v13 }
 0x933   :  { %v1321_v7 = vmul.f32 1.442695, %v1320_v14  ;;  %v1193_v25 = vpop.xlane.xlu0 %1192  ;;  %v1324_v27 = vmul.f32 1.442695, %v1323_v15  ;;  %v1185_v29 = vmul.f32 0.5, %v1184_v19  ;;  %2249 = vmatpush3.bf16.msra.mxu1 %v2248_v5  ;;  %v1863_v11 = vld [vmem:[%s3229_s5 + $0xa8] sm:$0xff] }
 0x934   :  { %2417 = vpow2.f32 %v1260_v20  ;;  %v1194_v31 = vmul.f32 0.5, %v1193_v25  ;;  %v1327_v32 = vmul.f32 1.442695, %v1326_v23  ;;  %2250 = vmatprep.subr.bf16.mxu1 %v2450_v42  ;;  %v2254_v12 = vpack.c.bf16 %v1863_v11, %v1862_v10  ;;  %v1865_v13 = vld [vmem:[%s3229_s5 + $0xb8] sm:$0xff] }
 0x935   :  { %2419 = vpow2.f32 %v1263_v21  ;;  %v1195_v33 = vmax.f32 %v1176_v24, %v1185_v29 }
 0x936   :  { %2421 = vpow2.f32 %v1266_v22 }
 0x937   :  { %2423 = vpow2.f32 %v1321_v7  ;;  %v1196_v34 = vmax.f32 %v1195_v33, %v1194_v31 }
 0x938   :  { %2425 = vpow2.f32 %v1324_v27 }
 0x939   :  { %2427 = vpow2.f32 %v1327_v32  ;;  %v1197_v35 = vsub.f32 %v1176_v24, %v1196_v34  ;;  %v1200_v36 = vsub.f32 %v1185_v29, %v1196_v34  ;;  %v1203_v28 = vsub.f32 %v1194_v31, %v1196_v34 }
 0x93b   :  { %v1198_v37 = vmul.f32 1.442695, %v1197_v35  ;;  %v1201_v39 = vmul.f32 1.442695, %v1200_v36  ;;  %v1204_v40 = vmul.f32 1.442695, %v1203_v28 }
 0x93d   :  { %2429 = vpow2.f32 %v1198_v37 }
 0x93e   :  { %v3002_v41 = vpop.eup %2417  ;;  %2431 = vpow2.f32 %v1201_v39 }
 0x93f   :  { %v2420_v43 = vpop.eup %2419  ;;  %2433 = vpow2.f32 %v1204_v40  ;;  %v1270_v19 = vmul.f32 %v3002_v41, %v2958_v9 }
 0x940   :  { %v2422_v44 = vpop.eup %2421  ;;  %v1271_v45 = vmul.f32 %v2420_v43, %v2967_v17  ;;  %v1268_v46 = vadd.f32 %v2420_v43, %v3002_v41 }
 0x941   :  { %v2424_v47 = vpop.eup %2423  ;;  %v1277_v16 = vmul.f32 %v2422_v44, %v2969_v18 }
 0x942   :  { %v2426_v48 = vpop.eup %2425  ;;  %1273 = vrot.lane.b32.xlu1 %v1271_v45, %s2453_s23  ;;  %v1269_v49 = vadd.f32 %v2422_v44, %v1268_v46  ;;  %v1331_v23 = vmul.f32 %v2424_v47, %v2958_v9 }
 0x943   :  { %v1332_v50 = vmul.f32 %v2426_v48, %v2967_v17  ;;  %v1329_v51 = vadd.f32 %v2426_v48, %v2424_v47  ;;  %v2428_v30 = vpop.eup %2427 }
 0x944   :  { %v1338_v0 = vmul.f32 %v2428_v30, %v2969_v18  ;;  %2435 = vrcp.f32 %v1269_v49 }
 0x945   :  { %1334 = vrot.lane.b32.xlu0 %v1332_v50, %s2453_s23  ;;  %v1330_v58 = vadd.f32 %v2428_v30, %v1329_v51 }
 0x946   :  { %1279 = vrot.lane.b32.xlu1 %v1277_v16, %s2454_s4 }
 0x947   :  { %v2430_v63 = vpop.eup %2429  ;;  %2437 = vrcp.f32 %v1330_v58 }
 0x948   :  { %v2432_v1 = vpop.eup %2431  ;;  %v1208_v31 = vmul.f32 %v2430_v63, %v2958_v9  ;;  %v1369_v9 = vld [vmem:[%s3227_s7 + $0x12] ss:$0 sm:$0xff] }
 0x949   :  { %v2434_v2 = vpop.eup %2433  ;;  %v1209_v3 = vmul.f32 %v2432_v1, %v2967_v17  ;;  %v1206_v4 = vadd.f32 %v2432_v1, %v2430_v63  ;;  %v2251_v17 = vpack.c.bf16 %v1861_v60, %v1860_v6  ;;  %v1486_v1 = vld [vmem:[%s3230_s6 + $0x8] sm:$0xff] }
 0x94a   :  { %1340 = vrot.lane.b32.xlu1 %v1338_v0, %s2454_s4  ;;  %v1215_v54 = vmul.f32 %v2434_v2, %v2969_v18  ;;  %v1864_v18 = vld [vmem:[%s3229_s5 + $0xb0] sm:$0xff]  ;;  %v1485_v0 = vld [vmem:[%s3230_s6] sm:$0xff] }
 0x94b   :  { %1211 = vrot.lane.b32.xlu0 %v1209_v3, %s2453_s23  ;;  %v1207_v8 = vadd.f32 %v2434_v2, %v1206_v4  ;;  %2252 = vmatpush3.bf16.msra.mxu1 %v2251_v17  ;;  %v2257_v14 = vpack.c.bf16 %v1865_v13, %v1864_v18  ;;  %v2259_v2 = vpack.c.bf16 %v1486_v1, %v1485_v0  ;;  %v1487_v3 = vld [vmem:[%s3230_s6 + $0x10] sm:$0xff]  ;;  %v1488_v4 = vld [vmem:[%s3230_s6 + $0x18] sm:$0xff] }
 0x94c   :  { %2253 = vmatprep.subr.bf16.mxu1 %v2450_v42  ;;  %v2263_v5 = vpack.c.bf16 %v1488_v4, %v1487_v3  ;;  %v1454_v13 = vld [vmem:[%s3227_s7 + $0x14] ss:$0 sm:$0xff] }
 0x94d   :  { %2439 = vrcp.f32 %v1207_v8  ;;  %2260 = vmatprep.subr.bf16.mxu0 %v2259_v2 }
 0x94e   :  { %1217 = vrot.lane.b32.xlu1 %v1215_v54, %s2454_s4  ;;  %v2436_v24 = vpop.eup %2435  ;;  %2262 = vmatpush3.bf16.msra.mxu0 %v2259_v2 }
 0x94f   :  { %2255 = vmatpush3.bf16.msra.mxu1 %v2254_v12  ;;  %2264 = vmatprep.subr.bf16.mxu0 %v2263_v5  ;;  %v1453_v12 = vld [vmem:[%s3227_s7 + $0x13] ss:$0 sm:$0xff] }
 0x950   :  { %2256 = vmatprep.subr.bf16.mxu1 %v2450_v42 }
 0x951   :  { %v2438_v33 = vpop.eup %2437 }
 0x952   :  { %2266 = vmatpush3.bf16.msra.mxu0 %v2263_v5 }
 0x953   :  { %2258 = vmatpush3.bf16.msra.mxu1 %v2257_v14 }
 0x954   :  { %2299 = vmatprep.subr.bf16.mxu1 %v2450_v42 }
 0x957   :  { %v2440_v39 = vpop.eup %2439 }
 0x9b4   :  { %v1274_v15 = vpop.permute.xlu1 %1273 }
 0x9b5   :  { %v1276_v20 = vadd.f32 %v1274_v15, %v1270_v19 }
 0x9b7   :  { %v1335_v21 = vpop.permute.xlu0 %1334 }
 0x9b8   :  { %v1280_v22 = vpop.permute.xlu1 %1279  ;;  %v1337_v25 = vadd.f32 %v1335_v21, %v1331_v23  ;;  %v1589_v23 = vld [vmem:[%s3230_s6 + $0x20] sm:$0xff] }
 0x9b9   :  { %v1282_v7 = vadd.f32 %v1280_v22, %v1276_v20 }
 0x9bb   :  { %v1284_v27 = vmul.f32 %v2436_v24, %v1282_v7  ;;  %v1590_v7 = vld [vmem:[%s3230_s6 + $0x28] sm:$0xff] }
 0x9bc   :  { %v1341_v29 = vpop.permute.xlu1 %1340  ;;  %v2267_v24 = vpack.c.bf16 %v1590_v7, %v1589_v23  ;;  %v1879_v7 = vld [vmem:[%s3229_s5 + $0x110] sm:$0xff] }
 0x9bd   :  { %v1343_v32 = vadd.f32 %v1341_v29, %v1337_v25  ;;  %1347 = vrot.lane.b32.xlu0 %v1284_v27, %s2455_s9  ;;  %v1212_v34 = vpop.permute.xlu0 %1211  ;;  %v1591_v25 = vld [vmem:[%s3230_s6 + $0x30] sm:$0xff]  ;;  %v1592_v27 = vld [vmem:[%s3230_s6 + $0x38] sm:$0xff] }
 0x9be   :  { %v1214_v35 = vadd.f32 %v1212_v34, %v1208_v31  ;;  %2268 = vmatprep.subr.bf16.mxu0 %v2267_v24  ;;  %v2271_v29 = vpack.c.bf16 %v1592_v27, %v1591_v25  ;;  %v1593_v31 = vld [vmem:[%s3230_s6 + $0x40] sm:$0xff]  ;;  %v1595_v34 = vld [vmem:[%s3230_s6 + $0x50] sm:$0xff] }
 0x9bf   :  { %v1345_v36 = vmul.f32 %v2438_v33, %v1343_v32  ;;  %v1594_v32 = vld [vmem:[%s3230_s6 + $0x48] sm:$0xff] }
 0x9c0   :  { %v1218_v28 = vpop.permute.xlu1 %1217  ;;  %v2275_v33 = vpack.c.bf16 %v1594_v32, %v1593_v31 }
 0x9c1   :  { %v1220_v37 = vadd.f32 %v1218_v28, %v1214_v35  ;;  %1351 = vrot.lane.b32.xlu1 %v1345_v36, %s2454_s4  ;;  %v1596_v35 = vld [vmem:[%s3230_s6 + $0x58] sm:$0xff]  ;;  %v1597_v36 = vld [vmem:[%s3230_s6 + $0x60] sm:$0xff] }
 0x9c2   :  { %v2279_v28 = vpack.c.bf16 %v1596_v35, %v1595_v34 }
 0x9c3   :  { %v1222_v40 = vmul.f32 %v2440_v39, %v1220_v37  ;;  %v1598_v37 = vld [vmem:[%s3230_s6 + $0x68] sm:$0xff] }
 0x9c4   :  { %v2283_v39 = vpack.c.bf16 %v1598_v37, %v1597_v36 }
 0xa2f   :  { %v1348_v41 = vpop.permute.xlu0 %1347 }
 0xa30   :  { %v1354_v43 = vsel %vm728_vm4, %v1222_v40, %v1348_v41  ;;  %v1599_v40 = vld [vmem:[%s3230_s6 + $0x70] sm:$0xff]  ;;  %v1600_v41 = vld [vmem:[%s3230_s6 + $0x78] sm:$0xff] }
 0xa33   :  { %v1352_v44 = vpop.permute.xlu1 %1351 }
 0xa34   :  { %v1355_v45 = vsel %vm730_vm5, %v1354_v43, %v1352_v44  ;;  %v2287_v43 = vpack.c.bf16 %v1600_v41, %v1599_v40  ;;  %v1601_v44 = vld [vmem:[%s3230_s6 + $0x80] sm:$0xff] }
 0xa35   :  { %2106 = vmatmul.mubr.msk.f32.vlgmr.msra.gmra.mrb[8].mxu1 %vm769_vm6, %v1355_v45  ;;  %v1602_v45 = vld [vmem:[%s3230_s6 + $0x88] sm:$0xff] }
 0xa36   :  { %2178 = vmatprep.mubr.msk.f32.mxu1 %vm2451_vm0, %v2452_v56 }
 0xb08   :  { %v1439_v46 = vpop.f32.mrb[8].mxu1 }
 0xb09   :  { %v1440_v47 = vadd.f32 %v1439_v46, %v1369_v9  ;;  %v2107_v48 = vpop.f32.mrb[9].mxu1  ;;  %v2291_v9 = vpack.c.bf16 %v1602_v45, %v1601_v44  ;;  %v1603_v46 = vld [vmem:[%s3230_s6 + $0x90] sm:$0xff] }
 0xb0b   :  { %v1443_v49 = vadd.f32 %v2858_v38, %v1440_v47  ;;  %v1604_v47 = vld [vmem:[%s3230_s6 + $0x98] sm:$0xff] }
 0xb0c   :  { %v2295_v48 = vpack.c.bf16 %v1604_v47, %v1603_v46  ;;  %v1790_v46 = vld [vmem:[%s3227_s7 + $0x21] ss:$0 sm:$0xff] }
 0xb0d   :  { %1449 = vrot.lane.b32.xlu1 %v1443_v49, %s2454_s4  ;;  %v1445_v50 = vrot.slane %v1443_v49, 4 }
 0xb0f   :  { %1446 = vrot.lane.b32.xlu0 %v1445_v50, %s2453_s23 }
 0xb7f   :  { %v3076_v51 = vpop.permute.xlu1 %1449 }
 0xb80   :  { %v1458_v52 = vsel %vm573_vm3, %v3076_v51, 0.0 }
 0xb81   :  { %1459 = vadd.xlane.f32.xlu1 %v1458_v52  ;;  %v1447_v56 = vpop.permute.xlu0 %1446 }
 0xb82   :  { %v3081_v53 = vsel %vm609_vm1, %v1443_v49, %v1447_v56  ;;  %v1489_v49 = vld [vmem:[%s3227_s7 + $0x15] ss:$0 sm:$0xff] }
 0xb83   :  { %v1455_v55 = vsel %vm728_vm4, %v3081_v53, 0.0 }
 0xb84   :  { %1456 = vadd.xlane.f32.xlu0 %v1455_v55 }
 0xc0e   :  { %v1460_v38 = vpop.xlane.xlu1 %1459 }
 0xc0f   :  { %v1462_v30 = vmul.f32 0.03125, %v1460_v38 }
 0xc11   :  { %v1457_v16 = vpop.xlane.xlu0 %1456  ;;  %v1464_v57 = vsub.f32 %v3076_v51, %v1462_v30 }
 0xc12   :  { %v1461_v26 = vmul.f32 0.03125, %v1457_v16 }
 0xc13   :  { %v1466_v62 = vmul.f32 %v1464_v57, %v1464_v57 }
 0xc14   :  { %v1463_v58 = vsub.f32 %v3081_v53, %v1461_v26 }
 0xc15   :  { %v1470_v63 = vsel %vm573_vm3, %v1466_v62, 0.0 }
 0xc16   :  { %v1465_v59 = vmul.f32 %v1463_v58, %v1463_v58 }
 0xc18   :  { %v1467_v61 = vsel %vm728_vm4, %v1465_v59, 0.0 }
 0xc19   :  { %1468 = vadd.xlane.f32.xlu0 %v1467_v61 }
 0xc1d   :  { %1471 = vadd.xlane.f32.xlu0 %v1470_v63 }
 0xca6   :  { %v1469_v6 = vpop.xlane.xlu0 %1468 }
 0xca7   :  { %v1473_v60 = vmul.f32 0.03125, %v1469_v6 }
 0xca9   :  { %v1475_v54 = vadd.f32 1e-05, %v1473_v60 }
 0xcaa   :  { %v1472_v8 = vpop.xlane.xlu0 %1471 }
 0xcab   :  { %2441 = vrsqrt.f32 %v1475_v54  ;;  %v1474_v17 = vmul.f32 0.03125, %v1472_v8  ;;  %v1869_v54 = vld [vmem:[%s3229_s5 + $0xc0] sm:$0xff]  ;;  %v1870_v8 = vld [vmem:[%s3229_s5 + $0xc8] sm:$0xff] }
 0xcad   :  { %v1476_v10 = vadd.f32 1e-05, %v1474_v17  ;;  %v1871_v17 = vld [vmem:[%s3229_s5 + $0xd0] sm:$0xff] }
 0xcaf   :  { %2443 = vrsqrt.f32 %v1476_v10  ;;  %v2300_v10 = vpack.c.bf16 %v1870_v8, %v1869_v54 }
 0xcb1   :  { %2301 = vmatpush3.bf16.msra.mxu1 %v2300_v10 }
 0xcb2   :  { %2302 = vmatprep.subr.bf16.mxu1 %v2450_v42 }
 0xcb5   :  { %v2442_v11 = vpop.eup %2441 }
 0xcb6   :  { %v1479_v18 = vmul.f32 %v2442_v11, %v1463_v58  ;;  %v1872_v11 = vld [vmem:[%s3229_s5 + $0xd8] sm:$0xff] }
 0xcb8   :  { %v1481_v14 = vmul.f32 %v1479_v18, %v1453_v12  ;;  %v1873_v18 = vld [vmem:[%s3229_s5 + $0xe0] sm:$0xff] }
 0xcb9   :  { %v2444_v15 = vpop.eup %2443 }
 0xcba   :  { %v1480_v19 = vmul.f32 %v2444_v15, %v1464_v57  ;;  %v1483_v20 = vadd.f32 %v1481_v14, %v1454_v13  ;;  %v1875_v15 = vld [vmem:[%s3229_s5 + $0xf0] sm:$0xff] }
 0xcbc   :  { %v1482_v21 = vmul.f32 %v1480_v19, %v1453_v12  ;;  %2116 = vmatprep.mubr.msk.f32.mxu0 %vm728_vm4, %v1483_v20  ;;  %v2303_v12 = vpack.c.bf16 %v1872_v11, %v1871_v17  ;;  %v1876_v19 = vld [vmem:[%s3229_s5 + $0xf8] sm:$0xff] }
 0xcbd   :  { %v2309_v20 = vpack.c.bf16 %v1876_v19, %v1875_v15 }
 0xcbe   :  { %v1484_v22 = vadd.f32 %v1482_v21, %v1454_v13  ;;  %v1874_v13 = vld [vmem:[%s3229_s5 + $0xe8] sm:$0xff]  ;;  %2304 = vmatpush3.bf16.msra.mxu1 %v2303_v12  ;;  %v1877_v21 = vld [vmem:[%s3229_s5 + $0x100] sm:$0xff] }
 0xcbf   :  { %v2306_v14 = vpack.c.bf16 %v1874_v13, %v1873_v18  ;;  %2305 = vmatprep.subr.bf16.mxu1 %v2450_v42 }
 0xcc0   :  { %2117 = vmatmul.mubr.msk.f32.vlgmr.msra.gmra.mrb[10].mxu0 %vm728_vm4, %v1484_v22  ;;  %v1878_v22 = vld [vmem:[%s3229_s5 + $0x108] sm:$0xff] }
 0xcc1   :  { %2270 = vmatpush3.bf16.msra.mxu0 %v2267_v24  ;;  %v2312_v23 = vpack.c.bf16 %v1878_v22, %v1877_v21  ;;  %v1880_v24 = vld [vmem:[%s3229_s5 + $0x118] sm:$0xff] }
 0xcc2   :  { %2272 = vmatprep.subr.bf16.mxu0 %v2271_v29  ;;  %2307 = vmatpush3.bf16.msra.mxu1 %v2306_v14  ;;  %v2315_v25 = vpack.c.bf16 %v1880_v24, %v1879_v7 }
 0xcc3   :  { %2308 = vmatprep.subr.bf16.mxu1 %v2450_v42 }
 0xcc5   :  { %2274 = vmatpush3.bf16.msra.mxu0 %v2271_v29  ;;  %v1682_v29 = vld [vmem:[%s3227_s7 + $0x16] ss:$0 sm:$0xff] }
 0xcc6   :  { %2276 = vmatprep.subr.bf16.mxu0 %v2275_v33  ;;  %2310 = vmatpush3.bf16.msra.mxu1 %v2309_v20 }
 0xcc7   :  { %2311 = vmatprep.subr.bf16.mxu1 %v2450_v42 }
 0xcc9   :  { %2278 = vmatpush3.bf16.msra.mxu0 %v2275_v33 }
 0xcca   :  { %2280 = vmatprep.subr.bf16.mxu0 %v2279_v28  ;;  %2313 = vmatpush3.bf16.msra.mxu1 %v2312_v23 }
 0xccb   :  { %2314 = vmatprep.subr.bf16.mxu1 %v2450_v42 }
 0xccd   :  { %2282 = vmatpush3.bf16.msra.mxu0 %v2279_v28 }
 0xcce   :  { %2284 = vmatprep.subr.bf16.mxu0 %v2283_v39  ;;  %2316 = vmatpush3.bf16.msra.mxu1 %v2315_v25 }
 0xcd1   :  { %2286 = vmatpush3.bf16.msra.mxu0 %v2283_v39 }
 0xcd2   :  { %2288 = vmatprep.subr.bf16.mxu0 %v2287_v43 }
 0xcd5   :  { %2290 = vmatpush3.bf16.msra.mxu0 %v2287_v43  ;;  %v1784_v43 = vld [vmem:[%s3227_s7 + $0x20] ss:$0 sm:$0xff] }
 0xcd6   :  { %2292 = vmatprep.subr.bf16.mxu0 %v2291_v9 }
 0xcd9   :  { %2294 = vmatpush3.bf16.msra.mxu0 %v2291_v9 }
 0xcda   :  { %2296 = vmatprep.subr.bf16.mxu0 %v2295_v48 }
 0xcdd   :  { %2298 = vmatpush3.bf16.msra.mxu0 %v2295_v48 }
 0xd93   :  { %v2118_v50 = vpop.f32.mrb[10].mxu0 }
 0xd94   :  { %v1568_v52 = vadd.f32 %v2118_v50, %v1489_v49  ;;  %v1562_v56 = vpop.f32.mrb[11].mxu0 }
 0xd95   :  { %v1563_v55 = vadd.f32 %v1562_v56, %v1489_v49 }
 0xd96   :  { %v1572_v38 = vmul.f32 %v1568_v52, %v1568_v52 }
 0xd97   :  { %v1571_v30 = vmul.f32 %v1563_v55, %v1563_v55 }
 0xd98   :  { %v1574_v16 = vmul.f32 %v1572_v38, %v1568_v52 }
 0xd99   :  { %v1573_v26 = vmul.f32 %v1571_v30, %v1563_v55 }
 0xd9a   :  { %v1576_v57 = vmul.f32 0.044715, %v1574_v16 }
 0xd9b   :  { %v1575_v58 = vmul.f32 0.044715, %v1573_v26 }
 0xd9c   :  { %v1578_v59 = vadd.f32 %v1576_v57, %v1568_v52 }
 0xd9d   :  { %v1577_v61 = vadd.f32 %v1575_v58, %v1563_v55 }
 0xd9e   :  { %v1580_v62 = vmul.f32 0.7978846, %v1578_v59 }
 0xd9f   :  { %v1579_v63 = vmul.f32 0.7978846, %v1577_v61 }
 0xda0   :  { %2445 = vtanh.f32 %v1580_v62 }
 0xda1   :  { %2447 = vtanh.f32 %v1579_v63 }
 0xdaa   :  { %v2446_v0 = vpop.eup %2445 }
 0xdab   :  { %v2448_v1 = vpop.eup %2447  ;;  %v1584_v2 = vadd.f32 1.0, %v2446_v0 }
 0xdac   :  { %v1583_v3 = vadd.f32 1.0, %v2448_v1 }
 0xdad   :  { %v1586_v4 = vmul.f32 0.5, %v1584_v2 }
 0xdae   :  { %v1585_v5 = vmul.f32 0.5, %v1583_v3 }
 0xdaf   :  { %v1588_v60 = vmul.f32 %v1586_v4, %v1568_v52 }
 0xdb0   :  { %v1587_v6 = vmul.f32 %v1585_v5, %v1563_v55 }
 0xdb2   :  { %2151 = vmatprep.mubr.f32.mxu0 %v1587_v6 }
 0xdb3   :  { %2152 = vmatmul.mubr.f32.vlgmr.msra.gmra.mrb[12].mxu0 %v1588_v60 }
 0xe86   :  { %v2153_v27 = vpop.f32.mrb[12].mxu0 }
 0xe87   :  { %v1681_v31 = vadd.f32 %v2153_v27, %v3076_v51  ;;  %v1671_v32 = vpop.f32.mrb[13].mxu0  ;;  %v1709_v51 = vld [vmem:[%s3227_s7 + $0x17] ss:$0 sm:$0xff] }
 0xe88   :  { %v1680_v42 = vadd.f32 %v1671_v32, %v3081_v53 }
 0xe89   :  { %v1684_v33 = vadd.f32 %v1682_v29, %v1681_v31 }
 0xe8a   :  { %v1683_v34 = vadd.f32 %v1682_v29, %v1680_v42 }
 0xe8b   :  { %1691 = vrot.lane.b32.xlu0 %v1684_v33, %s2454_s4 }
 0xe8c   :  { %v1686_v35 = vrot.slane %v1683_v34, 4 }
 0xe8e   :  { %1687 = vrot.lane.b32.xlu1 %v1686_v35, %s2455_s9 }
 0xefd   :  { %v1692_v28 = vpop.permute.xlu0 %1691 }
 0xf00   :  { %v1688_v36 = vpop.permute.xlu1 %1687 }
 0xf01   :  { %v1694_v37 = vsel %vm728_vm4, %v1683_v34, %v1688_v36 }
 0xf02   :  { %v1695_v39 = vsel %vm730_vm5, %v1694_v37, %v1692_v28 }
 0xf03   :  { %2179 = vmatmul.mubr.msk.f32.vlgmr.msra.gmra.mrb[10].mxu1 %vm769_vm6, %v1695_v39 }
 0xfd6   :  { %v1779_v53 = vpop.f32.mrb[10].mxu1 }
 0xfd7   :  { %v1780_v40 = vadd.f32 %v1779_v53, %v1709_v51  ;;  %v2180_v41 = vpop.f32.mrb[11].mxu1 }
 0xfd9   :  { %v1783_v44 = vmax.f32 %v1780_v40, 0.0 }
 0xfdb   :  { %v1785_v45 = vmul.f32 %v1784_v43, %v1783_v44 }
 0xfdd   :  { %v1787_v9 = vsel %vm1786_vm7, %v1785_v45, 0.0 }
 0xfde   :  { %1788 = vadd.xlane.f32.xlu1 %v1787_v9 }
0x106b   :  { %v1789_v47 = vpop.xlane.xlu1 %1788 }
0x106c   :  { %v1791_v48 = vadd.f32 %v1790_v46, %v1789_v47 }
0x106e   :  { %1793 = vst.msk [vmem:[%s3231_s8] sm:$0xf] %vm1792_vm8, %v1791_v48 }

</bundles_post_ra>
